<compile_context>
chip_gen: v5e
topology: v5e:2x2
jax: 0.10.0
libtpu: 0.0.40
codegen_flags: <defaults>
</compile_context>

<pallas_src>
import jax
import jax.numpy as jnp
from jax.experimental import pallas as pl
from jax.experimental.pallas import tpu as pltpu

K_IN = 28 * 28       # 784 logical input features (fed un-padded; 784 = 98*8)
HID = 300            # logical hidden width
HID_PAD = 384        # 3*128 lane-aligned hidden width (do NOT pad to 512)
OUT = 10             # logical logits
OUT_PAD = 128        # lane-dense output block (avoids masked partial stores)


def _pick_tile(n):
    """Batch tile: large for throughput, but guarantee >=2 grid steps when the
    batch allows it (so v7x megacore shards across both TensorCores) and avoid
    huge dead-work tiles for tiny batches.  Always a multiple of 8."""
    tn = 1024 if n >= 4096 else 512
    while tn > 8 and pl.cdiv(n, tn) < 2:
        tn //= 2
    return max(tn, 8)


def _mlp_kernel(x_ref,
                w1_ref, b1_ref, w2_ref, b2_ref, w3_ref, b3_ref,
                w4_ref, b4_ref, w5_ref, b5_ref,
                o_ref):
    """One (TN, 784) f32 batch tile flows through all 5 fused layers.

    Weights/biases are whole-array VMEM residents (single-buffered, DMA'd
    once); only the f32 x tile and the bf16 output tile stream through the
    pipeline.  The f32->bf16 input cast happens in-kernel so the wrapper never
    materializes a padded/cast copy of the batch in HBM.
    """
    def layer(h_bf16, w_ref, b_ref, relu):
        # bf16 x bf16 -> f32 accumulation on the MXU.
        acc = jnp.dot(h_bf16, w_ref[...], preferred_element_type=jnp.float32)
        acc = acc + b_ref[...]                 # f32 bias add (VPU)
        if relu:
            acc = jnp.maximum(acc, 0.0)        # f32 ReLU (VPU)
        return acc

    h = x_ref[...].astype(jnp.bfloat16)                          # (TN, 784) bf16
    h = layer(h, w1_ref, b1_ref, True).astype(jnp.bfloat16)      # (TN, HID_PAD)
    h = layer(h, w2_ref, b2_ref, True).astype(jnp.bfloat16)
    h = layer(h, w3_ref, b3_ref, True).astype(jnp.bfloat16)
    h = layer(h, w4_ref, b4_ref, True).astype(jnp.bfloat16)
    o_ref[...] = layer(h, w5_ref, b5_ref, False).astype(jnp.bfloat16)


@jax.jit
def fc_net_forward(x, packed_params):
    """x: (N, 1, 28, 28) or (N, 784) float32. Returns (N, 10) float32 logits."""
    n = x.shape[0]
    x2d = x.reshape(n, K_IN)                      # stays f32; no HBM cast pass

    tn = _pick_tile(n)
    n_pad = pl.cdiv(n, tn) * tn
    if n_pad != n:                                # skip the pad when aligned
        x2d = jnp.pad(x2d, ((0, n_pad - n), (0, 0)))

    (w1, b1), (w2, b2), (w3, b3), (w4, b4), (w5, b5) = packed_params
    weights = (w1, b1, w2, b2, w3, b3, w4, b4, w5, b5)

    # Whole-array VMEM residents: copied in once, single buffer, no re-DMA
    # across grid steps (vs. default double-buffered pipelined operands).
    resident = pl.BlockSpec(memory_space=pltpu.MemorySpace.VMEM)

    # VMEM footprint @ tn=1024: 2 x (tn,784) f32 x-tiles ~6.3 MiB
    # + 2 x (tn,128) bf16 out tiles ~0.5 MiB + ~1.6 MiB bf16 weights (single)
    # + f32 intermediates  => ~12 MiB.  32 MiB leaves headroom on every gen.
    vmem_bytes = 32 * 1024 * 1024

    out = pl.pallas_call(
        _mlp_kernel,
        out_shape=jax.ShapeDtypeStruct((n_pad, OUT_PAD), jnp.bfloat16),
        grid=(n_pad // tn,),
        in_specs=[pl.BlockSpec((tn, K_IN), lambda i: (i, 0))]
                 + [resident] * len(weights),
        out_specs=pl.BlockSpec((tn, OUT_PAD), lambda i: (i, 0)),
        compiler_params=pltpu.CompilerParams(
            dimension_semantics=("parallel",),     # megacore sharding on v7x
            vmem_limit_bytes=vmem_bytes),
    )(x2d, *weights)

    return out[:n, :OUT].astype(jnp.float32)


def init_params(key):
    """Deterministic init matching nn.Linear default: U(-1/sqrt(in), 1/sqrt(in)).

    Logical (unpadded) f32 params; weights stored as (in_features, out_features)
    — the transpose of PyTorch's (out, in) — biases as (out_features,).
    """
    dims = [(K_IN, HID), (HID, HID), (HID, HID), (HID, HID), (HID, OUT)]
    params = []
    for fan_in, fan_out in dims:
        key, kw, kb = jax.random.split(key, 3)
        bound = 1.0 / jnp.sqrt(jnp.float32(fan_in))
        w = jax.random.uniform(kw, (fan_in, fan_out), jnp.float32, -bound, bound)
        b = jax.random.uniform(kb, (fan_out,), jnp.float32, -bound, bound)
        params.append((w, b))
    return params


def pack_params(params):
    """Zero-pad output dims to lane-aligned widths; weights -> bf16,
    biases -> f32 (1, out_pad).  Layer 1 keeps its logical 784 input rows."""
    dims_pad = [(K_IN, HID_PAD), (HID_PAD, HID_PAD), (HID_PAD, HID_PAD),
                (HID_PAD, HID_PAD), (HID_PAD, OUT_PAD)]
    packed = []
    for (w, b), (in_pad, out_pad) in zip(params, dims_pad):
        fan_in, fan_out = w.shape
        wp = jnp.zeros((in_pad, out_pad), jnp.bfloat16).at[:fan_in, :fan_out].set(
            w.astype(jnp.bfloat16))
        bp = jnp.zeros((1, out_pad), jnp.float32).at[0, :fan_out].set(b)
        packed.append((wp, bp))
    return tuple(packed)


def fc_net_reference(x, params):
    """Pure-JAX f32 reference (exact PyTorch semantics)."""
    h = x.reshape(x.shape[0], K_IN)
    for i, (w, b) in enumerate(params):
        h = h @ w + b
        if i < len(params) - 1:
            h = jnp.maximum(h, 0.0)
    return h


def fc_net_reference_bf16(x, params):
    """Pure-JAX reference mimicking the kernel's bf16-operand / f32-accumulate
    path, including the final bf16 output cast."""
    h = x.reshape(x.shape[0], K_IN).astype(jnp.bfloat16)
    for i, (w, b) in enumerate(params):
        acc = jnp.dot(h, w.astype(jnp.bfloat16),
                      preferred_element_type=jnp.float32) + b
        if i < len(params) - 1:
            h = jnp.maximum(acc, 0.0).astype(jnp.bfloat16)
        else:
            h = acc.astype(jnp.bfloat16)
    return h.astype(jnp.float32)


if __name__ == "__main__":
    key = jax.random.PRNGKey(0)
    key, kx = jax.random.split(key)

    # Small MNIST-like batch: (N=2, C=1, H=28, W=28), NCHW like the PyTorch module.
    x = jax.random.normal(kx, (2, 1, 28, 28), dtype=jnp.float32)
    params = init_params(key)
    packed = pack_params(params)

    out = fc_net_forward(x, packed)
    out = jax.block_until_ready(out)
    assert out.shape == (2, OUT), out.shape

    ref_bf16 = fc_net_reference_bf16(x, params)   # same-numerics reference
    ref_f32 = fc_net_reference(x, params)         # exact f32 semantics
    assert jnp.allclose(out, ref_bf16, atol=1e-2, rtol=1e-2), \
        "mismatch vs bf16-path reference"
    assert jnp.allclose(out, ref_f32, atol=5e-2, rtol=5e-2), \
        "mismatch vs f32 reference"

    print("KERNEL_OK")
</pallas_src>

<mosaic_0001>
module attributes {stable_mosaic.version = 11 : i64} {
  func.func @_mlp_kernel(%arg0: i32, %arg1: memref<8x784xf32, #tpu.memory_space<vmem>>, %arg2: memref<784x384xbf16, #tpu.memory_space<vmem>>, %arg3: memref<1x384xf32, #tpu.memory_space<vmem>>, %arg4: memref<384x384xbf16, #tpu.memory_space<vmem>>, %arg5: memref<1x384xf32, #tpu.memory_space<vmem>>, %arg6: memref<384x384xbf16, #tpu.memory_space<vmem>>, %arg7: memref<1x384xf32, #tpu.memory_space<vmem>>, %arg8: memref<384x384xbf16, #tpu.memory_space<vmem>>, %arg9: memref<1x384xf32, #tpu.memory_space<vmem>>, %arg10: memref<384x128xbf16, #tpu.memory_space<vmem>>, %arg11: memref<1x128xf32, #tpu.memory_space<vmem>>, %arg12: memref<8x128xbf16, #tpu.memory_space<vmem>>) attributes {dimension_semantics = [#tpu.dimension_semantics<parallel>], iteration_bounds = array<i64: 1>, scalar_prefetch = 0 : i64, scratch_operands = 0 : i64, tpu.core_type = #tpu.core_type<tc>, window_params = [{transform_indices = @transform_0, window_bounds = array<i64: 8, 784>}, {pipeline_mode = #tpu.pipeline_mode<synchronous>, transform_indices = @transform_1, window_bounds = array<i64: 784, 384>}, {pipeline_mode = #tpu.pipeline_mode<synchronous>, transform_indices = @transform_2, window_bounds = array<i64: 1, 384>}, {pipeline_mode = #tpu.pipeline_mode<synchronous>, transform_indices = @transform_3, window_bounds = array<i64: 384, 384>}, {pipeline_mode = #tpu.pipeline_mode<synchronous>, transform_indices = @transform_4, window_bounds = array<i64: 1, 384>}, {pipeline_mode = #tpu.pipeline_mode<synchronous>, transform_indices = @transform_5, window_bounds = array<i64: 384, 384>}, {pipeline_mode = #tpu.pipeline_mode<synchronous>, transform_indices = @transform_6, window_bounds = array<i64: 1, 384>}, {pipeline_mode = #tpu.pipeline_mode<synchronous>, transform_indices = @transform_7, window_bounds = array<i64: 384, 384>}, {pipeline_mode = #tpu.pipeline_mode<synchronous>, transform_indices = @transform_8, window_bounds = array<i64: 1, 384>}, {pipeline_mode = #tpu.pipeline_mode<synchronous>, transform_indices = @transform_9, window_bounds = array<i64: 384, 128>}, {pipeline_mode = #tpu.pipeline_mode<synchronous>, transform_indices = @transform_10, window_bounds = array<i64: 1, 128>}, {transform_indices = @transform_11, window_bounds = array<i64: 8, 128>}]} {
    %c0 = arith.constant 0 : index
    %c0_0 = arith.constant 0 : index
    %0 = vector.load %arg1[%c0, %c0_0] : memref<8x784xf32, #tpu.memory_space<vmem>>, vector<8x784xf32>
    %1 = arith.truncf %0 : vector<8x784xf32> to vector<8x784xbf16>
    %c0_1 = arith.constant 0 : index
    %c0_2 = arith.constant 0 : index
    %2 = vector.load %arg2[%c0_1, %c0_2] : memref<784x384xbf16, #tpu.memory_space<vmem>>, vector<784x384xbf16>
    %cst = arith.constant dense<0.000000e+00> : vector<8x384xf32>
    %3 = tpu.matmul %1, %2, %cst {dimension_numbers = #tpu.dot_dimension_numbers<[1], [0], [0], [1], [0, 0, 1, 1], [], []>} : vector<8x784xbf16>, vector<784x384xbf16>, vector<8x384xf32> -> vector<8x384xf32>
    %c0_3 = arith.constant 0 : index
    %c0_4 = arith.constant 0 : index
    %4 = vector.load %arg3[%c0_3, %c0_4] : memref<1x384xf32, #tpu.memory_space<vmem>>, vector<1x384xf32>
    %5 = vector.broadcast %4 : vector<1x384xf32> to vector<8x384xf32>
    %6 = arith.addf %3, %5 : vector<8x384xf32>
    %cst_5 = arith.constant 0.000000e+00 : f32
    %7 = vector.broadcast %cst_5 : f32 to vector<8x384xf32>
    %8 = arith.maximumf %6, %7 : vector<8x384xf32>
    %9 = arith.truncf %8 : vector<8x384xf32> to vector<8x384xbf16>
    %c0_6 = arith.constant 0 : index
    %c0_7 = arith.constant 0 : index
    %10 = vector.load %arg4[%c0_6, %c0_7] : memref<384x384xbf16, #tpu.memory_space<vmem>>, vector<384x384xbf16>
    %cst_8 = arith.constant dense<0.000000e+00> : vector<8x384xf32>
    %11 = tpu.matmul %9, %10, %cst_8 {dimension_numbers = #tpu.dot_dimension_numbers<[1], [0], [0], [1], [0, 0, 1, 1], [], []>} : vector<8x384xbf16>, vector<384x384xbf16>, vector<8x384xf32> -> vector<8x384xf32>
    %c0_9 = arith.constant 0 : index
    %c0_10 = arith.constant 0 : index
    %12 = vector.load %arg5[%c0_9, %c0_10] : memref<1x384xf32, #tpu.memory_space<vmem>>, vector<1x384xf32>
    %13 = vector.broadcast %12 : vector<1x384xf32> to vector<8x384xf32>
    %14 = arith.addf %11, %13 : vector<8x384xf32>
    %cst_11 = arith.constant 0.000000e+00 : f32
    %15 = vector.broadcast %cst_11 : f32 to vector<8x384xf32>
    %16 = arith.maximumf %14, %15 : vector<8x384xf32>
    %17 = arith.truncf %16 : vector<8x384xf32> to vector<8x384xbf16>
    %c0_12 = arith.constant 0 : index
    %c0_13 = arith.constant 0 : index
    %18 = vector.load %arg6[%c0_12, %c0_13] : memref<384x384xbf16, #tpu.memory_space<vmem>>, vector<384x384xbf16>
    %cst_14 = arith.constant dense<0.000000e+00> : vector<8x384xf32>
    %19 = tpu.matmul %17, %18, %cst_14 {dimension_numbers = #tpu.dot_dimension_numbers<[1], [0], [0], [1], [0, 0, 1, 1], [], []>} : vector<8x384xbf16>, vector<384x384xbf16>, vector<8x384xf32> -> vector<8x384xf32>
    %c0_15 = arith.constant 0 : index
    %c0_16 = arith.constant 0 : index
    %20 = vector.load %arg7[%c0_15, %c0_16] : memref<1x384xf32, #tpu.memory_space<vmem>>, vector<1x384xf32>
    %21 = vector.broadcast %20 : vector<1x384xf32> to vector<8x384xf32>
    %22 = arith.addf %19, %21 : vector<8x384xf32>
    %cst_17 = arith.constant 0.000000e+00 : f32
    %23 = vector.broadcast %cst_17 : f32 to vector<8x384xf32>
    %24 = arith.maximumf %22, %23 : vector<8x384xf32>
    %25 = arith.truncf %24 : vector<8x384xf32> to vector<8x384xbf16>
    %c0_18 = arith.constant 0 : index
    %c0_19 = arith.constant 0 : index
    %26 = vector.load %arg8[%c0_18, %c0_19] : memref<384x384xbf16, #tpu.memory_space<vmem>>, vector<384x384xbf16>
    %cst_20 = arith.constant dense<0.000000e+00> : vector<8x384xf32>
    %27 = tpu.matmul %25, %26, %cst_20 {dimension_numbers = #tpu.dot_dimension_numbers<[1], [0], [0], [1], [0, 0, 1, 1], [], []>} : vector<8x384xbf16>, vector<384x384xbf16>, vector<8x384xf32> -> vector<8x384xf32>
    %c0_21 = arith.constant 0 : index
    %c0_22 = arith.constant 0 : index
    %28 = vector.load %arg9[%c0_21, %c0_22] : memref<1x384xf32, #tpu.memory_space<vmem>>, vector<1x384xf32>
    %29 = vector.broadcast %28 : vector<1x384xf32> to vector<8x384xf32>
    %30 = arith.addf %27, %29 : vector<8x384xf32>
    %cst_23 = arith.constant 0.000000e+00 : f32
    %31 = vector.broadcast %cst_23 : f32 to vector<8x384xf32>
    %32 = arith.maximumf %30, %31 : vector<8x384xf32>
    %33 = arith.truncf %32 : vector<8x384xf32> to vector<8x384xbf16>
    %c0_24 = arith.constant 0 : index
    %c0_25 = arith.constant 0 : index
    %34 = vector.load %arg10[%c0_24, %c0_25] : memref<384x128xbf16, #tpu.memory_space<vmem>>, vector<384x128xbf16>
    %cst_26 = arith.constant dense<0.000000e+00> : vector<8x128xf32>
    %35 = tpu.matmul %33, %34, %cst_26 {dimension_numbers = #tpu.dot_dimension_numbers<[1], [0], [0], [1], [0, 0, 1, 1], [], []>} : vector<8x384xbf16>, vector<384x128xbf16>, vector<8x128xf32> -> vector<8x128xf32>
    %c0_27 = arith.constant 0 : index
    %c0_28 = arith.constant 0 : index
    %36 = vector.load %arg11[%c0_27, %c0_28] : memref<1x128xf32, #tpu.memory_space<vmem>>, vector<1x128xf32>
    %37 = vector.broadcast %36 : vector<1x128xf32> to vector<8x128xf32>
    %38 = arith.addf %35, %37 : vector<8x128xf32>
    %39 = arith.truncf %38 : vector<8x128xf32> to vector<8x128xbf16>
    %c0_29 = arith.constant 0 : index
    %c0_30 = arith.constant 0 : index
    %40 = vector.load %arg12[%c0_29, %c0_30] : memref<8x128xbf16, #tpu.memory_space<vmem>>, vector<8x128xbf16>
    tpu.vector_store %arg12[%c0_29, %c0_30], %39 {strides = array<i32>} : memref<8x128xbf16, #tpu.memory_space<vmem>>, vector<8x128xbf16>,
    return
  }
  func.func @transform_0(%arg0: i32) -> (i32, i32) {
    %c0_i32 = arith.constant 0 : i32
    %c0_i32_0 = arith.constant 0 : i32
    return %arg0, %c0_i32 : i32, i32
  }
  func.func @transform_1(%arg0: i32) -> (i32, i32) {
    %c0_i32 = arith.constant 0 : i32
    %c0_i32_0 = arith.constant 0 : i32
    %c0_i32_1 = arith.constant 0 : i32
    return %c0_i32, %c0_i32_0 : i32, i32
  }
  func.func @transform_2(%arg0: i32) -> (i32, i32) {
    %c0_i32 = arith.constant 0 : i32
    %c0_i32_0 = arith.constant 0 : i32
    %c0_i32_1 = arith.constant 0 : i32
    return %c0_i32, %c0_i32_0 : i32, i32
  }
  func.func @transform_3(%arg0: i32) -> (i32, i32) {
    %c0_i32 = arith.constant 0 : i32
    %c0_i32_0 = arith.constant 0 : i32
    %c0_i32_1 = arith.constant 0 : i32
    return %c0_i32, %c0_i32_0 : i32, i32
  }
  func.func @transform_4(%arg0: i32) -> (i32, i32) {
    %c0_i32 = arith.constant 0 : i32
    %c0_i32_0 = arith.constant 0 : i32
    %c0_i32_1 = arith.constant 0 : i32
    return %c0_i32, %c0_i32_0 : i32, i32
  }
  func.func @transform_5(%arg0: i32) -> (i32, i32) {
    %c0_i32 = arith.constant 0 : i32
    %c0_i32_0 = arith.constant 0 : i32
    %c0_i32_1 = arith.constant 0 : i32
    return %c0_i32, %c0_i32_0 : i32, i32
  }
  func.func @transform_6(%arg0: i32) -> (i32, i32) {
    %c0_i32 = arith.constant 0 : i32
    %c0_i32_0 = arith.constant 0 : i32
    %c0_i32_1 = arith.constant 0 : i32
    return %c0_i32, %c0_i32_0 : i32, i32
  }
  func.func @transform_7(%arg0: i32) -> (i32, i32) {
    %c0_i32 = arith.constant 0 : i32
    %c0_i32_0 = arith.constant 0 : i32
    %c0_i32_1 = arith.constant 0 : i32
    return %c0_i32, %c0_i32_0 : i32, i32
  }
  func.func @transform_8(%arg0: i32) -> (i32, i32) {
    %c0_i32 = arith.constant 0 : i32
    %c0_i32_0 = arith.constant 0 : i32
    %c0_i32_1 = arith.constant 0 : i32
    return %c0_i32, %c0_i32_0 : i32, i32
  }
  func.func @transform_9(%arg0: i32) -> (i32, i32) {
    %c0_i32 = arith.constant 0 : i32
    %c0_i32_0 = arith.constant 0 : i32
    %c0_i32_1 = arith.constant 0 : i32
    return %c0_i32, %c0_i32_0 : i32, i32
  }
  func.func @transform_10(%arg0: i32) -> (i32, i32) {
    %c0_i32 = arith.constant 0 : i32
    %c0_i32_0 = arith.constant 0 : i32
    %c0_i32_1 = arith.constant 0 : i32
    return %c0_i32, %c0_i32_0 : i32, i32
  }
  func.func @transform_11(%arg0: i32) -> (i32, i32) {
    %c0_i32 = arith.constant 0 : i32
    %c0_i32_0 = arith.constant 0 : i32
    return %arg0, %c0_i32 : i32, i32
  }
}

</mosaic_0001>

<bundles_post_ra>
// kernel: fc_net_forward.1
= control target key start
LH: loop header
LB: loop body
LE: loop exit
PB: predicated region body
PF: predicated region fallthrough
CT: control target
= control target key end

     0   :  { %16 = vsyncpa [#allocation3], 0  ;;  %s5784_s0 = inlined_call_operand.vmem [shape: f32[8,784], index: 0, kind: input, shape index: {}]   ;;  %s5785_s1 = inlined_call_operand.hbm [shape: bf16[784,384], index: 1, kind: input, shape index: {}]   ;;  %s5786_s2 = inlined_call_operand.vmem [shape: f32[1,384], index: 2, kind: input, shape index: {}]   ;;  %s5787_s3 = inlined_call_operand.hbm [shape: bf16[384,384], index: 3, kind: input, shape index: {}]   ;;  %s5788_s4 = inlined_call_operand.vmem [shape: f32[1,384], index: 4, kind: input, shape index: {}]   ;;  %s5789_s5 = inlined_call_operand.hbm [shape: bf16[384,384], index: 5, kind: input, shape index: {}]   ;;  %s5790_s6 = inlined_call_operand.vmem [shape: f32[1,384], index: 6, kind: input, shape index: {}]   ;;  %s5791_s7 = inlined_call_operand.hbm [shape: bf16[384,384], index: 7, kind: input, shape index: {}]   ;;  %s5792_s8 = inlined_call_operand.vmem [shape: f32[1,384], index: 8, kind: input, shape index: {}]   ;;  %s5793_s9 = inlined_call_operand.vmem [shape: bf16[384,128], index: 9, kind: input, shape index: {}]   ;;  %s5794_s10 = inlined_call_operand.vmem [shape: f32[1,128], index: 10, kind: input, shape index: {}]   ;;  %s5795_s11 = inlined_call_operand.vmem [shape: bf16[8,128], index: 11, kind: output, shape index: {}]  }
   0x1   :  { %17 = vsyncpa [#allocation5], 0 }
   0x2   :  { %18 = vsyncpa [#allocation8], 0  ;;  %s40_s19 = sshll.u32 %s5787_s3, 4  ;;  %s5511_s20 = smov [#allocation4]   ;;  %s41_s19 = int_to_ptr.hbm [resolvable:$true] %s40_s19 }
   0x3   :  { %s42_s21 = sshll.u32 %s5511_s20, 4  ;;  %s25_s24 = sshll.u32 %s5785_s1, 4  ;;  %s43_s21 = int_to_ptr.vmem [resolvable:$true] %s42_s21  ;;  %s26_s24 = int_to_ptr.hbm [resolvable:$true] %s25_s24 }
   0x4   :  { %s5512_s25 = smov 192   ;;  %s5513_s26 = smov 12  }
   0x5   :  { %48 = dma.hbm_to_vmem [thread:$0]  %s41_s19, 9216, %s43_s21, [#allocation5], %s5512_s25, %s5512_s25, %s5513_s26  }
   0x6   :  { %s5514_s27 = smov [#allocation2]   ;;  %s55_s12 = sshll.u32 %s5789_s5, 4  ;;  %s56_s12 = int_to_ptr.hbm [resolvable:$true] %s55_s12 }
   0x7   :  { %s27_s28 = sshll.u32 %s5514_s27, 4  ;;  %s70_s14 = sshll.u32 %s5791_s7, 4  ;;  %s28_s28 = int_to_ptr.vmem [resolvable:$true] %s27_s28  ;;  %s71_s14 = int_to_ptr.hbm [resolvable:$true] %s70_s14 }
   0x8   :  { %33 = dma.hbm_to_vmem [thread:$0]  %s26_s24, 18816, %s28_s28, [#allocation3], %s5512_s25, %s5512_s25, %s5513_s26  }
   0x9   :  { %s5515_s15 = smov [#allocation6]   ;;  %s5516_s1 = smov [#allocation7]  }
   0xa   :  { %s57_s16 = sshll.u32 %s5515_s15, 4  ;;  %s72_s17 = sshll.u32 %s5516_s1, 4  ;;  %s58_s16 = int_to_ptr.vmem [resolvable:$true] %s57_s16  ;;  %s73_s17 = int_to_ptr.vmem [resolvable:$true] %s72_s17 }
   0xb   :  { %63 = dma.hbm_to_vmem [thread:$0]  %s56_s12, 9216, %s58_s16, [#allocation5], %s5512_s25, %s5512_s25, %s5513_s26  }
   0xc   :  { %78 = dma.hbm_to_vmem [thread:$0]  %s71_s14, 9216, %s73_s17, [#allocation8], %s5512_s25, %s5512_s25, %s5513_s26  }
   0xd   :  { %5505 = dma.done.wait [#allocation3], 18816  }
   0xe   :  { %5506 = vsyncadd [#allocation3], 4294948480 }
   0xf   :  { %5507 = dma.done.wait [#allocation5], 18432  }
  0x10   :  { %5508 = vsyncadd [#allocation5], 4294948864 }
  0x11   :  { %5509 = dma.done.wait [#allocation8], 9216  }
  0x12   :  { %5510 = vsyncadd [#allocation8], 4294958080  ;;  %v3550_v0 = vld [vmem:[#allocation2 + $0xa8] sm:$0xf]  ;;  %v5037_v1 = vld [vmem:[#allocation2 + $0xb0] sm:$0xf0] }
  0x13   :  { %v3646_v2 = vld [vmem:[#allocation2 + $0x168] sm:$0xf]  ;;  %v3551_v3 = vor.u32 %v5037_v1, %v3550_v0  ;;  %v5061_v4 = vld [vmem:[#allocation2 + $0x170] sm:$0xf0]  ;;  %v3538_v11 = vld [vmem:[#allocation2 + $0x90] sm:$0xf] }
  0x14   :  { %v3742_v5 = vld [vmem:[#allocation2 + $0x228] sm:$0xf]  ;;  %v5085_v6 = vld [vmem:[#allocation2 + $0x230] sm:$0xf0]  ;;  %v3647_v7 = vor.u32 %v5061_v4, %v3646_v2  ;;  %v5034_v13 = vld [vmem:[#allocation2 + $0x98] sm:$0xf0] }
  0x15   :  { %v3743_v8 = vor.u32 %v5085_v6, %v3742_v5  ;;  %v3838_v9 = vld [vmem:[#allocation2 + $0x2e8] sm:$0xf]  ;;  %v5109_v10 = vld [vmem:[#allocation2 + $0x2f0] sm:$0xf0]  ;;  %1108 = vmatpush.bf16.msra.mxu0 %v3551_v3  ;;  %v3634_v14 = vld [vmem:[#allocation2 + $0x150] sm:$0xf]  ;;  %v3539_v16 = vor.u32 %v5034_v13, %v3538_v11 }
  0x16   :  { %v3839_v12 = vor.u32 %v5109_v10, %v3838_v9  ;;  %v5058_v15 = vld [vmem:[#allocation2 + $0x158] sm:$0xf0]  ;;  %1121 = vmatpush.bf16.msra.mxu1 %v3647_v7  ;;  %v3730_v18 = vld [vmem:[#allocation2 + $0x210] sm:$0xf]  ;;  %v3526_v23 = vld [vmem:[#allocation2 + $0x78] sm:$0xf] }
  0x17   :  { %1134 = vmatpush.bf16.msra.mxu2 %v3743_v8  ;;  %v3635_v17 = vor.u32 %v5058_v15, %v3634_v14  ;;  %v5082_v19 = vld [vmem:[#allocation2 + $0x218] sm:$0xf0]  ;;  %v3826_v20 = vld [vmem:[#allocation2 + $0x2d0] sm:$0xf]  ;;  %v5031_v24 = vld [vmem:[#allocation2 + $0x80] sm:$0xf0] }
  0x18   :  { %1147 = vmatpush.bf16.msra.mxu3 %v3839_v12  ;;  %v3731_v21 = vor.u32 %v5082_v19, %v3730_v18  ;;  %v5106_v22 = vld [vmem:[#allocation2 + $0x2d8] sm:$0xf0]  ;;  %v3622_v26 = vld [vmem:[#allocation2 + $0x138] sm:$0xf]  ;;  %v5055_v27 = vld [vmem:[#allocation2 + $0x140] sm:$0xf0]  ;;  %v3527_v29 = vor.u32 %v5031_v24, %v3526_v23 }
  0x19   :  { %v3827_v25 = vor.u32 %v5106_v22, %v3826_v20  ;;  %v3718_v28 = vld [vmem:[#allocation2 + $0x1f8] sm:$0xf]  ;;  %1109 = vmatpush.bf16.msra.mxu0 %v3539_v16  ;;  %v5079_v30 = vld [vmem:[#allocation2 + $0x200] sm:$0xf0]  ;;  %v3623_v33 = vor.u32 %v5055_v27, %v3622_v26  ;;  %v3514_v35 = vld [vmem:[#allocation2 + $0x60] sm:$0xf] }
  0x1a   :  { %v3814_v31 = vld [vmem:[#allocation2 + $0x2b8] sm:$0xf]  ;;  %v5103_v32 = vld [vmem:[#allocation2 + $0x2c0] sm:$0xf0]  ;;  %1122 = vmatpush.bf16.msra.mxu1 %v3635_v17  ;;  %v3719_v34 = vor.u32 %v5079_v30, %v3718_v28  ;;  %v5028_v36 = vld [vmem:[#allocation2 + $0x68] sm:$0xf0] }
  0x1b   :  { %1135 = vmatpush.bf16.msra.mxu2 %v3731_v21  ;;  %v3610_v37 = vld [vmem:[#allocation2 + $0x120] sm:$0xf]  ;;  %v3815_v38 = vor.u32 %v5103_v32, %v3814_v31  ;;  %v5052_v39 = vld [vmem:[#allocation2 + $0x128] sm:$0xf0]  ;;  %v3515_v44 = vor.u32 %v5028_v36, %v3514_v35  ;;  %v3502_v47 = vld [vmem:[#allocation2 + $0x48] sm:$0xf] }
  0x1c   :  { %1148 = vmatpush.bf16.msra.mxu3 %v3827_v25  ;;  %v3706_v40 = vld [vmem:[#allocation2 + $0x1e0] sm:$0xf]  ;;  %v5076_v41 = vld [vmem:[#allocation2 + $0x1e8] sm:$0xf0]  ;;  %v3611_v45 = vor.u32 %v5052_v39, %v3610_v37  ;;  %v5025_v48 = vld [vmem:[#allocation2 + $0x50] sm:$0xf0] }
  0x1d   :  { %v3802_v42 = vld [vmem:[#allocation2 + $0x2a0] sm:$0xf]  ;;  %v5100_v43 = vld [vmem:[#allocation2 + $0x2a8] sm:$0xf0]  ;;  %1110 = vmatpush.bf16.msra.mxu0 %v3527_v29  ;;  %v3707_v46 = vor.u32 %v5076_v41, %v3706_v40  ;;  %v3598_v49 = vld [vmem:[#allocation2 + $0x108] sm:$0xf]  ;;  %v3503_v56 = vor.u32 %v5025_v48, %v3502_v47 }
  0x1e   :  { %1123 = vmatpush.bf16.msra.mxu1 %v3623_v33  ;;  %v3803_v50 = vor.u32 %v5100_v43, %v3802_v42  ;;  %v5049_v51 = vld [vmem:[#allocation2 + $0x110] sm:$0xf0]  ;;  %v3694_v52 = vld [vmem:[#allocation2 + $0x1c8] sm:$0xf]  ;;  %v3490_v59 = vld [vmem:[#allocation2 + $0x30] sm:$0xf] }
  0x1f   :  { %1136 = vmatpush.bf16.msra.mxu2 %v3719_v34  ;;  %v5073_v53 = vld [vmem:[#allocation2 + $0x1d0] sm:$0xf0]  ;;  %v3790_v54 = vld [vmem:[#allocation2 + $0x288] sm:$0xf]  ;;  %v3599_v57 = vor.u32 %v5049_v51, %v3598_v49  ;;  %v5022_v60 = vld [vmem:[#allocation2 + $0x38] sm:$0xf0] }
  0x20   :  { %1149 = vmatpush.bf16.msra.mxu3 %v3815_v38  ;;  %v5097_v55 = vld [vmem:[#allocation2 + $0x290] sm:$0xf0]  ;;  %v3695_v58 = vor.u32 %v5073_v53, %v3694_v52  ;;  %v3586_v61 = vld [vmem:[#allocation2 + $0xf0] sm:$0xf]  ;;  %v5046_v63 = vld [vmem:[#allocation2 + $0xf8] sm:$0xf0]  ;;  %v3491_v4 = vor.u32 %v5022_v60, %v3490_v59 }
  0x21   :  { %1111 = vmatpush.bf16.msra.mxu0 %v3515_v44  ;;  %v3791_v62 = vor.u32 %v5097_v55, %v3790_v54  ;;  %v3682_v0 = vld [vmem:[#allocation2 + $0x1b0] sm:$0xf]  ;;  %v5070_v1 = vld [vmem:[#allocation2 + $0x1b8] sm:$0xf0]  ;;  %v3587_v5 = vor.u32 %v5046_v63, %v3586_v61  ;;  %v3478_v7 = vld [vmem:[#allocation2 + $0x18] sm:$0xf] }
  0x22   :  { %1124 = vmatpush.bf16.msra.mxu1 %v3611_v45  ;;  %v3778_v2 = vld [vmem:[#allocation2 + $0x270] sm:$0xf]  ;;  %v5094_v3 = vld [vmem:[#allocation2 + $0x278] sm:$0xf0]  ;;  %v3683_v6 = vor.u32 %v5070_v1, %v3682_v0  ;;  %v5019_v8 = vld [vmem:[#allocation2 + $0x20] sm:$0xf0] }
  0x23   :  { %1137 = vmatpush.bf16.msra.mxu2 %v3707_v46  ;;  %v3574_v9 = vld [vmem:[#allocation2 + $0xd8] sm:$0xf]  ;;  %v3779_v10 = vor.u32 %v5094_v3, %v3778_v2  ;;  %v5043_v11 = vld [vmem:[#allocation2 + $0xe0] sm:$0xf0]  ;;  %v3479_v16 = vor.u32 %v5019_v8, %v3478_v7  ;;  %v3466_v17 = vld [vmem:[#allocation2] sm:$0xf] }
  0x24   :  { %1150 = vmatpush.bf16.msra.mxu3 %v3803_v50  ;;  %v3670_v12 = vld [vmem:[#allocation2 + $0x198] sm:$0xf]  ;;  %v5067_v13 = vld [vmem:[#allocation2 + $0x1a0] sm:$0xf0]  ;;  %v5016_v18 = vld [vmem:[#allocation2 + $0x8] sm:$0xf0]  ;;  %v3575_v19 = vor.u32 %v5043_v11, %v3574_v9 }
  0x25   :  { %1112 = vmatpush.bf16.msra.mxu0 %v3503_v56  ;;  %v3766_v14 = vld [vmem:[#allocation2 + $0x258] sm:$0xf]  ;;  %v5091_v15 = vld [vmem:[#allocation2 + $0x260] sm:$0xf0]  ;;  %v3671_v20 = vor.u32 %v5067_v13, %v3670_v12  ;;  %v3562_v21 = vld [vmem:[#allocation2 + $0xc0] sm:$0xf]  ;;  %v3467_v31 = vor.u32 %v5016_v18, %v3466_v17 }
  0x26   :  { %1125 = vmatpush.bf16.msra.mxu1 %v3599_v57  ;;  %v5040_v22 = vld [vmem:[#allocation2 + $0xc8] sm:$0xf0]  ;;  %v3658_v23 = vld [vmem:[#allocation2 + $0x180] sm:$0xf]  ;;  %v3767_v24 = vor.u32 %v5091_v15, %v3766_v14  ;;  %v3934_v28 = vld [vmem:[#allocation2 + $0x3a8] sm:$0xf] }
  0x27   :  { %1138 = vmatpush.bf16.msra.mxu2 %v3695_v58  ;;  %v5064_v25 = vld [vmem:[#allocation2 + $0x188] sm:$0xf0]  ;;  %v3754_v26 = vld [vmem:[#allocation2 + $0x240] sm:$0xf]  ;;  %v5133_v29 = vld [vmem:[#allocation2 + $0x3b0] sm:$0xf0]  ;;  %v3563_v35 = vor.u32 %v5040_v22, %v3562_v21 }
  0x28   :  { %1151 = vmatpush.bf16.msra.mxu3 %v3791_v62  ;;  %v5088_v27 = vld [vmem:[#allocation2 + $0x248] sm:$0xf0]  ;;  %v4030_v30 = vld [vmem:[#allocation2 + $0x468] sm:$0xf]  ;;  %v5157_v32 = vld [vmem:[#allocation2 + $0x470] sm:$0xf0]  ;;  %v3659_v36 = vor.u32 %v5064_v25, %v3658_v23  ;;  %v3935_v40 = vor.u32 %v5133_v29, %v3934_v28 }
  0x29   :  { %1113 = vmatpush.bf16.msra.mxu0 %v3491_v4  ;;  %v5036_v33 = vld [vmem:[#allocation2 + $0xac] sm:$0xf]  ;;  %v3552_v34 = vld [vmem:[#allocation2 + $0xb4] sm:$0xf0]  ;;  %v4042_v37 = vld [vmem:[#allocation2 + $0x480] sm:$0xf]  ;;  %v3755_v39 = vor.u32 %v5088_v27, %v3754_v26  ;;  %v4031_v44 = vor.u32 %v5157_v32, %v4030_v30 }
  0x2a   :  { %1126 = vmatpush.bf16.msra.mxu1 %v3587_v5  ;;  %v5160_v38 = vld [vmem:[#allocation2 + $0x488] sm:$0xf0]  ;;  %v104_v41 = vld [vmem:[%s5784_s0 + $0x10] sm:$0xff]  ;;  %v3648_v43 = vld [vmem:[#allocation2 + $0x174] sm:$0xf0]  ;;  %v3555_v45 = vor.u32 %v5036_v33, %v3552_v34  ;;  %vm1104_vm0 = vcmask 130048  }
  0x2b   :  { %1139 = vmatpush.bf16.msra.mxu2 %v3683_v6  ;;  %v5060_v42 = vld [vmem:[#allocation2 + $0x16c] sm:$0xf]  ;;  %v3922_v46 = vld [vmem:[#allocation2 + $0x390] sm:$0xf]  ;;  %v5130_v47 = vld [vmem:[#allocation2 + $0x398] sm:$0xf0]  ;;  %v4043_v49 = vor.u32 %v5160_v38, %v4042_v37  ;;  %v5592_v53 = vpack.c.bf16 %v104_v41, %v104_v41 }
  0x2c   :  { %1152 = vmatpush.bf16.msra.mxu3 %v3779_v10  ;;  %v4018_v48 = vld [vmem:[#allocation2 + $0x450] sm:$0xf]  ;;  %v5154_v50 = vld [vmem:[#allocation2 + $0x458] sm:$0xf0]  ;;  %v5033_v51 = vld [vmem:[#allocation2 + $0x94] sm:$0xf]  ;;  %v3651_v55 = vor.u32 %v5060_v42, %v3648_v43  ;;  %v3923_v56 = vor.u32 %v5130_v47, %v3922_v46 }
  0x2d   :  { %1114 = vmatpush.bf16.msra.mxu0 %v3479_v16  ;;  %v3540_v52 = vld [vmem:[#allocation2 + $0x9c] sm:$0xf0]  ;;  %v5057_v57 = vld [vmem:[#allocation2 + $0x154] sm:$0xf]  ;;  %v3910_v59 = vld [vmem:[#allocation2 + $0x378] sm:$0xf]  ;;  %v4019_v61 = vor.u32 %v5154_v50, %v4018_v48 }
  0x2e   :  { %1127 = vmatpush.bf16.msra.mxu1 %v3575_v19  ;;  %v102_v54 = vld [vmem:[%s5784_s0] sm:$0xff]  ;;  %v3543_v62 = vor.u32 %v5033_v51, %v3540_v52  ;;  %v4006_v0 = vld [vmem:[#allocation2 + $0x438] sm:$0xf]  ;;  %v5030_v2 = vld [vmem:[#allocation2 + $0x7c] sm:$0xf] }
  0x2f   :  { %1140 = vmatpush.bf16.msra.mxu2 %v3671_v20  ;;  %v3636_v58 = vld [vmem:[#allocation2 + $0x15c] sm:$0xf0]  ;;  %v5597_v60 = vpack.c.bf16 %v102_v54, %v102_v54  ;;  %v5127_v63 = vld [vmem:[#allocation2 + $0x380] sm:$0xf0]  ;;  %v3528_v3 = vld [vmem:[#allocation2 + $0x84] sm:$0xf0] }
  0x30   :  { %1153 = vmatpush.bf16.msra.mxu3 %v3767_v24  ;;  %v5151_v1 = vld [vmem:[#allocation2 + $0x440] sm:$0xf0]  ;;  %v103_v4 = vld [vmem:[%s5784_s0 + $0x8] sm:$0xff]  ;;  %v3639_v6 = vor.u32 %v5057_v57, %v3636_v58  ;;  %v3911_v7 = vor.u32 %v5127_v63, %v3910_v59  ;;  %v5054_v8 = vld [vmem:[#allocation2 + $0x13c] sm:$0xf]  ;;  %v3531_v12 = vor.u32 %v5030_v2, %v3528_v3 }
  0x31   :  { %1115 = vmatpush.bf16.msra.mxu0 %v3467_v31  ;;  %v5604_v5 = vpack.c.bf16 %v103_v4, %v103_v4  ;;  %v3624_v9 = vld [vmem:[#allocation2 + $0x144] sm:$0xf0]  ;;  %v3898_v10 = vld [vmem:[#allocation2 + $0x360] sm:$0xf]  ;;  %v4007_v11 = vor.u32 %v5151_v1, %v4006_v0  ;;  %v5124_v13 = vld [vmem:[#allocation2 + $0x368] sm:$0xf0] }
  0x32   :  { %1128 = vmatpush.bf16.msra.mxu1 %v3563_v35  ;;  %v3994_v14 = vld [vmem:[#allocation2 + $0x420] sm:$0xf]  ;;  %v105_v15 = vld [vmem:[%s5784_s0 + $0x18] sm:$0xff]  ;;  %v5148_v16 = vld [vmem:[#allocation2 + $0x428] sm:$0xf0]  ;;  %v3627_v20 = vor.u32 %v5054_v8, %v3624_v9  ;;  %v3899_v21 = vor.u32 %v5124_v13, %v3898_v10 }
  0x33   :  { %1141 = vmatpush.bf16.msra.mxu2 %v3659_v36  ;;  %v5027_v17 = vld [vmem:[#allocation2 + $0x64] sm:$0xf]  ;;  %v3516_v18 = vld [vmem:[#allocation2 + $0x6c] sm:$0xf0]  ;;  %v5610_v19 = vpack.c.bf16 %v105_v15, %v105_v15  ;;  %v3995_v24 = vor.u32 %v5148_v16, %v3994_v14  ;;  %v3886_v26 = vld [vmem:[#allocation2 + $0x348] sm:$0xf] }
  0x34   :  { %1154 = vmatpush.bf16.msra.mxu3 %v3755_v39  ;;  %1116 = vmatmul.bf16.vlgmr.msra.gmra.mxu0 %v5597_v60  ;;  %v5051_v22 = vld [vmem:[#allocation2 + $0x124] sm:$0xf]  ;;  %v3612_v23 = vld [vmem:[#allocation2 + $0x12c] sm:$0xf0]  ;;  %v3519_v25 = vor.u32 %v5027_v17, %v3516_v18  ;;  %v5121_v27 = vld [vmem:[#allocation2 + $0x350] sm:$0xf0] }
  0x35   :  { %1160 = vmatpush.bf16.msrb.mxu0 %v3935_v40  ;;  %1129 = vmatmul.bf16.vlgmr.msra.gmra.mxu1 %v5604_v5  ;;  %v3982_v28 = vld [vmem:[#allocation2 + $0x408] sm:$0xf]  ;;  %v5145_v29 = vld [vmem:[#allocation2 + $0x410] sm:$0xf0]  ;;  %v5024_v30 = vld [vmem:[#allocation2 + $0x4c] sm:$0xf]  ;;  %v3615_v32 = vor.u32 %v5051_v22, %v3612_v23  ;;  %v3887_v33 = vor.u32 %v5121_v27, %v3886_v26 }
  0x36   :  { %1173 = vmatpush.bf16.msrb.mxu1 %v4031_v44  ;;  %1142 = vmatmul.bf16.vlgmr.msra.gmra.mxu2 %v5592_v53  ;;  %v3504_v31 = vld [vmem:[#allocation2 + $0x54] sm:$0xf0]  ;;  %v5048_v34 = vld [vmem:[#allocation2 + $0x10c] sm:$0xf]  ;;  %v108_v36 = vld [vmem:[%s5784_s0 + $0x30] sm:$0xff]  ;;  %v3983_v37 = vor.u32 %v5145_v29, %v3982_v28 }
  0x37   :  { %1193 = vmatpush.bf16.msrb.mxu2 %v4043_v49  ;;  %1155 = vmatmul.bf16.vlgmr.msra.gmra.mxu3 %v5610_v19  ;;  %v3600_v35 = vld [vmem:[#allocation2 + $0x114] sm:$0xf0]  ;;  %v3507_v38 = vor.u32 %v5024_v30, %v3504_v31  ;;  %v3874_v39 = vld [vmem:[#allocation2 + $0x330] sm:$0xf]  ;;  %v5118_v40 = vld [vmem:[#allocation2 + $0x338] sm:$0xf0] }
  0x38   :  { %1199 = vmatpush.bf16.msrb.mxu3 %v3555_v45  ;;  %v3970_v41 = vld [vmem:[#allocation2 + $0x3f0] sm:$0xf]  ;;  %v5142_v42 = vld [vmem:[#allocation2 + $0x3f8] sm:$0xf0]  ;;  %v5021_v43 = vld [vmem:[#allocation2 + $0x34] sm:$0xf]  ;;  %v5616_v45 = vpack.c.bf16 %v108_v36, %v108_v36  ;;  %v3603_v46 = vor.u32 %v5048_v34, %v3600_v35  ;;  %v3875_v47 = vor.u32 %v5118_v40, %v3874_v39 }
  0x39   :  { %1161 = vmatpush.bf16.msrb.mxu0 %v3923_v56  ;;  %v3492_v44 = vld [vmem:[#allocation2 + $0x3c] sm:$0xf0]  ;;  %v5045_v48 = vld [vmem:[#allocation2 + $0xf4] sm:$0xf]  ;;  %v3971_v50 = vor.u32 %v5142_v42, %v3970_v41  ;;  %v3862_v52 = vld [vmem:[#allocation2 + $0x318] sm:$0xf] }
  0x3a   :  { %1174 = vmatpush.bf16.msrb.mxu1 %v4019_v61  ;;  %v3588_v49 = vld [vmem:[#allocation2 + $0xfc] sm:$0xf0]  ;;  %v3495_v51 = vor.u32 %v5021_v43, %v3492_v44  ;;  %v5115_v54 = vld [vmem:[#allocation2 + $0x320] sm:$0xf0]  ;;  %v5018_v57 = vld [vmem:[#allocation2 + $0x1c] sm:$0xf] }
  0x3b   :  { %1212 = vmatpush.bf16.msra.mxu2 %v3651_v55  ;;  %v3958_v55 = vld [vmem:[#allocation2 + $0x3d8] sm:$0xf]  ;;  %v5139_v56 = vld [vmem:[#allocation2 + $0x3e0] sm:$0xf0]  ;;  %v3480_v58 = vld [vmem:[#allocation2 + $0x24] sm:$0xf0]  ;;  %v3591_v59 = vor.u32 %v5045_v48, %v3588_v49  ;;  %v3863_v61 = vor.u32 %v5115_v54, %v3862_v52 }
  0x3c   :  { %1200 = vmatpush.bf16.msrb.mxu3 %v3543_v62  ;;  %v5042_v62 = vld [vmem:[#allocation2 + $0xdc] sm:$0xf]  ;;  %v3576_v63 = vld [vmem:[#allocation2 + $0xe4] sm:$0xf0]  ;;  %v3850_v0 = vld [vmem:[#allocation2 + $0x300] sm:$0xf]  ;;  %v3959_v1 = vor.u32 %v5139_v56, %v3958_v55  ;;  %v3483_v2 = vor.u32 %v5018_v57, %v3480_v58 }
  0x3d   :  { %1162 = vmatpush.bf16.msrb.mxu0 %v3911_v7  ;;  %v5112_v3 = vld [vmem:[#allocation2 + $0x308] sm:$0xf0]  ;;  %v3946_v4 = vld [vmem:[#allocation2 + $0x3c0] sm:$0xf]  ;;  %v5015_v7 = vld [vmem:[#allocation2 + $0x4] sm:$0xf]  ;;  %v3579_v13 = vor.u32 %v5042_v62, %v3576_v63 }
  0x3e   :  { %1175 = vmatpush.bf16.msrb.mxu1 %v4007_v11  ;;  %v3468_v8 = vld [vmem:[#allocation2 + $0xc] sm:$0xf0]  ;;  %v5084_v9 = vld [vmem:[#allocation2 + $0x22c] sm:$0xf]  ;;  %v3744_v10 = vld [vmem:[#allocation2 + $0x234] sm:$0xf0]  ;;  %v3851_v14 = vor.u32 %v5112_v3, %v3850_v0 }
  0x3f   :  { %1213 = vmatpush.bf16.msra.mxu2 %v3639_v6  ;;  %v5136_v6 = vld [vmem:[#allocation2 + $0x3c8] sm:$0xf0]  ;;  %v3936_v16 = vld [vmem:[#allocation2 + $0x3b4] sm:$0xf0]  ;;  %v106_v17 = vld [vmem:[%s5784_s0 + $0x20] sm:$0xff] }
  0x40   :  { %1201 = vmatpush.bf16.msrb.mxu3 %v3531_v12  ;;  %v5108_v11 = vld [vmem:[#allocation2 + $0x2ec] sm:$0xf]  ;;  %v3840_v12 = vld [vmem:[#allocation2 + $0x2f4] sm:$0xf0]  ;;  %v3947_v18 = vor.u32 %v5136_v6, %v3946_v4  ;;  %v3564_v22 = vld [vmem:[#allocation2 + $0xcc] sm:$0xf0]  ;;  %v5626_v30 = vpack.c.bf16 %v106_v17, %v106_v17 }
  0x41   :  { %1163 = vmatpush.bf16.msrb.mxu0 %v3899_v21  ;;  %v5132_v15 = vld [vmem:[#allocation2 + $0x3ac] sm:$0xf]  ;;  %v5039_v21 = vld [vmem:[#allocation2 + $0xc4] sm:$0xf]  ;;  %v4032_v27 = vld [vmem:[#allocation2 + $0x474] sm:$0xf0] }
  0x42   :  { %1176 = vmatpush.bf16.msrb.mxu1 %v3995_v24  ;;  %v107_v23 = vld [vmem:[%s5784_s0 + $0x28] sm:$0xff]  ;;  %v3747_v24 = vor.u32 %v5084_v9, %v3744_v10  ;;  %v5081_v28 = vld [vmem:[#allocation2 + $0x214] sm:$0xf]  ;;  %v3939_v29 = vor.u32 %v5132_v15, %v3936_v16  ;;  %v3732_v31 = vld [vmem:[#allocation2 + $0x21c] sm:$0xf0]  ;;  %v3567_v34 = vor.u32 %v5039_v21, %v3564_v22 }
  0x43   :  { %1214 = vmatpush.bf16.msra.mxu2 %v3627_v20  ;;  %v3471_v20 = vor.u32 %v5015_v7, %v3468_v8  ;;  %v5156_v26 = vld [vmem:[#allocation2 + $0x46c] sm:$0xf]  ;;  %v5628_v35 = vpack.c.bf16 %v107_v23, %v107_v23  ;;  %v5129_v36 = vld [vmem:[#allocation2 + $0x394] sm:$0xf]  ;;  %v3735_v39 = vor.u32 %v5081_v28, %v3732_v31  ;;  %v4020_v42 = vld [vmem:[#allocation2 + $0x45c] sm:$0xf0] }
  0x44   :  { %1202 = vmatpush.bf16.msrb.mxu3 %v3519_v25  ;;  %v3843_v25 = vor.u32 %v5108_v11, %v3840_v12  ;;  %v5153_v41 = vld [vmem:[#allocation2 + $0x454] sm:$0xf]  ;;  %v5078_v43 = vld [vmem:[#allocation2 + $0x1fc] sm:$0xf]  ;;  %v3816_v48 = vld [vmem:[#allocation2 + $0x2c4] sm:$0xf0] }
  0x45   :  { %1164 = vmatpush.bf16.msrb.mxu0 %v3887_v33  ;;  %v3828_v33 = vld [vmem:[#allocation2 + $0x2dc] sm:$0xf0]  ;;  %v5126_v49 = vld [vmem:[#allocation2 + $0x37c] sm:$0xf]  ;;  %v4008_v56 = vld [vmem:[#allocation2 + $0x444] sm:$0xf0] }
  0x46   :  { %1177 = vmatpush.bf16.msrb.mxu1 %v3983_v37  ;;  %4052 = vmatmul.msk.bf16.vlgmr.msrb.gmra.mxu2 %vm1104_vm0, %v5616_v45  ;;  %v3924_v37 = vld [vmem:[#allocation2 + $0x39c] sm:$0xf0]  ;;  %v5150_v55 = vld [vmem:[#allocation2 + $0x43c] sm:$0xf]  ;;  %v5075_v57 = vld [vmem:[#allocation2 + $0x1e4] sm:$0xf] }
  0x47   :  { %1215 = vmatpush.bf16.msra.mxu2 %v3615_v32  ;;  %v5105_v32 = vld [vmem:[#allocation2 + $0x2d4] sm:$0xf]  ;;  %v3927_v44 = vor.u32 %v5129_v36, %v3924_v37  ;;  %v3804_v62 = vld [vmem:[#allocation2 + $0x2ac] sm:$0xf0]  ;;  %v5123_v63 = vld [vmem:[#allocation2 + $0x364] sm:$0xf] }
  0x48   :  { %1203 = vmatpush.bf16.msrb.mxu3 %v3507_v38  ;;  %v4035_v38 = vor.u32 %v5156_v26, %v4032_v27  ;;  %v3831_v40 = vor.u32 %v5105_v32, %v3828_v33  ;;  %v3900_v0 = vld [vmem:[#allocation2 + $0x36c] sm:$0xf0]  ;;  %v5147_v4 = vld [vmem:[#allocation2 + $0x424] sm:$0xf]  ;;  %v5072_v7 = vld [vmem:[#allocation2 + $0x1cc] sm:$0xf] }
  0x49   :  { %1165 = vmatpush.bf16.msrb.mxu0 %v3875_v47  ;;  %v5102_v47 = vld [vmem:[#allocation2 + $0x2bc] sm:$0xf]  ;;  %v3996_v6 = vld [vmem:[#allocation2 + $0x42c] sm:$0xf0]  ;;  %v3903_v8 = vor.u32 %v5123_v63, %v3900_v0  ;;  %v3696_v9 = vld [vmem:[#allocation2 + $0x1d4] sm:$0xf0] }
  0x4a   :  { %1178 = vmatpush.bf16.msrb.mxu1 %v3971_v50  ;;  %v3912_v50 = vld [vmem:[#allocation2 + $0x384] sm:$0xf0]  ;;  %v3819_v54 = vor.u32 %v5102_v47, %v3816_v48  ;;  %v5096_v10 = vld [vmem:[#allocation2 + $0x28c] sm:$0xf]  ;;  %v3792_v11 = vld [vmem:[#allocation2 + $0x294] sm:$0xf0]  ;;  %v3699_v15 = vor.u32 %v5072_v7, %v3696_v9 }
  0x4b   :  { %1216 = vmatpush.bf16.msra.mxu2 %v3603_v46  ;;  %v3720_v46 = vld [vmem:[#allocation2 + $0x204] sm:$0xf0]  ;;  %v3915_v58 = vor.u32 %v5126_v49, %v3912_v50  ;;  %v5120_v12 = vld [vmem:[#allocation2 + $0x34c] sm:$0xf]  ;;  %v3795_v16 = vor.u32 %v5096_v10, %v3792_v11  ;;  %v3684_v22 = vld [vmem:[#allocation2 + $0x1bc] sm:$0xf0] }
  0x4c   :  { %1204 = vmatpush.bf16.msrb.mxu3 %v3495_v51  ;;  %v4023_v51 = vor.u32 %v5153_v41, %v4020_v42  ;;  %v3723_v52 = vor.u32 %v5078_v43, %v3720_v46  ;;  %v5144_v17 = vld [vmem:[#allocation2 + $0x40c] sm:$0xf]  ;;  %v5093_v23 = vld [vmem:[#allocation2 + $0x274] sm:$0xf]  ;;  %v3876_v26 = vld [vmem:[#allocation2 + $0x33c] sm:$0xf0] }
  0x4d   :  { %1166 = vmatpush.bf16.msrb.mxu0 %v3863_v61  ;;  %v5099_v61 = vld [vmem:[#allocation2 + $0x2a4] sm:$0xf]  ;;  %v5141_v31 = vld [vmem:[#allocation2 + $0x3f4] sm:$0xf]  ;;  %v3972_v32 = vld [vmem:[#allocation2 + $0x3fc] sm:$0xf0] }
  0x4e   :  { %1179 = vmatpush.bf16.msrb.mxu1 %v3959_v1  ;;  %v4011_v1 = vor.u32 %v5150_v55, %v4008_v56  ;;  %v3807_v3 = vor.u32 %v5099_v61, %v3804_v62  ;;  %v5066_v33 = vld [vmem:[#allocation2 + $0x19c] sm:$0xf]  ;;  %v3672_v36 = vld [vmem:[#allocation2 + $0x1a4] sm:$0xf0]  ;;  %v3975_v41 = vor.u32 %v5141_v31, %v3972_v32  ;;  %v5063_v47 = vld [vmem:[#allocation2 + $0x184] sm:$0xf] }
  0x4f   :  { %1217 = vmatpush.bf16.msra.mxu2 %v3591_v59  ;;  %v3708_v59 = vld [vmem:[#allocation2 + $0x1ec] sm:$0xf0]  ;;  %v5090_v37 = vld [vmem:[#allocation2 + $0x25c] sm:$0xf]  ;;  %v3960_v43 = vld [vmem:[#allocation2 + $0x3e4] sm:$0xf0] }
  0x50   :  { %1205 = vmatpush.bf16.msrb.mxu3 %v3483_v2  ;;  %v3711_v2 = vor.u32 %v5075_v57, %v3708_v59  ;;  %v5138_v42 = vld [vmem:[#allocation2 + $0x3dc] sm:$0xf]  ;;  %v3660_v48 = vld [vmem:[#allocation2 + $0x18c] sm:$0xf0]  ;;  %v5087_v49 = vld [vmem:[#allocation2 + $0x244] sm:$0xf] }
  0x51   :  { %1167 = vmatpush.bf16.msrb.mxu0 %v3851_v14  ;;  %v3999_v14 = vor.u32 %v5147_v4, %v3996_v6  ;;  %v3654_v55 = vld [vmem:[#allocation2 + $0x170] sm:$0xf]  ;;  %v5159_v56 = vld [vmem:[#allocation2 + $0x484] sm:$0xf]  ;;  %v5062_v59 = vld [vmem:[#allocation2 + $0x178] sm:$0xf0]  ;;  %v3663_v63 = vor.u32 %v5063_v47, %v3660_v48 }
  0x52   :  { %1180 = vmatpush.bf16.msrb.mxu1 %v3947_v18  ;;  %v3984_v18 = vld [vmem:[#allocation2 + $0x414] sm:$0xf0]  ;;  %v4044_v57 = vld [vmem:[#allocation2 + $0x48c] sm:$0xf0]  ;;  %v5086_v62 = vld [vmem:[#allocation2 + $0x238] sm:$0xf0] }
  0x53   :  { %1218 = vmatpush.bf16.msra.mxu2 %v3579_v13  ;;  %v3888_v13 = vld [vmem:[#allocation2 + $0x354] sm:$0xf0]  ;;  %v3987_v27 = vor.u32 %v5144_v17, %v3984_v18  ;;  %v3750_v61 = vld [vmem:[#allocation2 + $0x230] sm:$0xf]  ;;  %v4047_v4 = vor.u32 %v5159_v56, %v4044_v57  ;;  %v5038_v7 = vld [vmem:[#allocation2 + $0xb8] sm:$0xf0] }
  0x54   :  { %1206 = vmatpush.bf16.msrb.mxu3 %v3471_v20  ;;  %1168 = vmatmul.bf16.vlgmr.msrb.gmra.mxu0 %v5626_v30  ;;  %v5069_v20 = vld [vmem:[#allocation2 + $0x1b4] sm:$0xf]  ;;  %v3891_v21 = vor.u32 %v5120_v12, %v3888_v13  ;;  %v3558_v6 = vld [vmem:[#allocation2 + $0xb0] sm:$0xf]  ;;  %v3642_v9 = vld [vmem:[#allocation2 + $0x158] sm:$0xf]  ;;  %v3751_v10 = vor.u32 %v5086_v62, %v3750_v61 }
  0x55   :  { %1225 = vmatpush.bf16.msra.mxu0 %v3747_v24  ;;  %1181 = vmatmul.bf16.vlgmr.msrb.gmra.mxu1 %v5628_v35  ;;  %v3780_v24 = vld [vmem:[#allocation2 + $0x27c] sm:$0xf0]  ;;  %v3687_v28 = vor.u32 %v5069_v20, %v3684_v22  ;;  %v3846_v11 = vld [vmem:[#allocation2 + $0x2f0] sm:$0xf]  ;;  %v5110_v12 = vld [vmem:[#allocation2 + $0x2f8] sm:$0xf0]  ;;  %v3559_v17 = vor.u32 %v5038_v7, %v3558_v6 }
  0x56   :  { %1238 = vmatpush.bf16.msra.mxu1 %v3843_v25  ;;  %v5117_v25 = vld [vmem:[#allocation2 + $0x334] sm:$0xf]  ;;  %v5059_v13 = vld [vmem:[#allocation2 + $0x160] sm:$0xf0]  ;;  %v3546_v18 = vld [vmem:[#allocation2 + $0x98] sm:$0xf] }
  0x57   :  { %1219 = vmatpush.bf16.msra.mxu2 %v3567_v34  ;;  %1207 = vmatmul.bf16.vlgmr.msrb.gmra.mxu3 %v5597_v60  ;;  %v3879_v34 = vor.u32 %v5117_v25, %v3876_v26  ;;  %v5035_v20 = vld [vmem:[#allocation2 + $0xa0] sm:$0xf0]  ;;  %v3643_v22 = vor.u32 %v5059_v13, %v3642_v9  ;;  %v3834_v25 = vld [vmem:[#allocation2 + $0x2d8] sm:$0xf]  ;;  %v3534_v32 = vld [vmem:[#allocation2 + $0x80] sm:$0xf] }
  0x58   :  { %1251 = vmatpush.bf16.msra.mxu3 %v3939_v29  ;;  %v3783_v29 = vor.u32 %v5093_v23, %v3780_v24  ;;  %v3630_v23 = vld [vmem:[#allocation2 + $0x140] sm:$0xf]  ;;  %v5107_v26 = vld [vmem:[#allocation2 + $0x2e0] sm:$0xf0]  ;;  %v3547_v31 = vor.u32 %v5035_v20, %v3546_v18  ;;  %v5029_v47 = vld [vmem:[#allocation2 + $0x70] sm:$0xf0] }
  0x59   :  { %1226 = vmatpush.bf16.msra.mxu0 %v3735_v39  ;;  %v5114_v39 = vld [vmem:[#allocation2 + $0x31c] sm:$0xf]  ;;  %v3702_v56 = vld [vmem:[#allocation2 + $0x1d0] sm:$0xf]  ;;  %v3690_v6 = vld [vmem:[#allocation2 + $0x1b8] sm:$0xf] }
  0x5a   :  { %1239 = vmatpush.bf16.msra.mxu1 %v3831_v40  ;;  %1220 = vmatmul.bf16.vlgmr.msra.gmra.mxu2 %v5604_v5  ;;  %v3864_v40 = vld [vmem:[#allocation2 + $0x324] sm:$0xf0]  ;;  %v5074_v57 = vld [vmem:[#allocation2 + $0x1d8] sm:$0xf0]  ;;  %v5071_v7 = vld [vmem:[#allocation2 + $0x1c0] sm:$0xf0] }
  0x5b   :  { %1264 = vmatpush.bf16.msrb.mxu2 %v4035_v38  ;;  %v3768_v38 = vld [vmem:[#allocation2 + $0x264] sm:$0xf0]  ;;  %v3867_v50 = vor.u32 %v5114_v39, %v3864_v40  ;;  %v3822_v39 = vld [vmem:[#allocation2 + $0x2c0] sm:$0xf]  ;;  %v5104_v40 = vld [vmem:[#allocation2 + $0x2c8] sm:$0xf0] }
  0x5c   :  { %1252 = vmatpush.bf16.msra.mxu3 %v3927_v44  ;;  %v3675_v44 = vor.u32 %v5066_v33, %v3672_v36  ;;  %v3771_v46 = vor.u32 %v5090_v37, %v3768_v38  ;;  %v5032_v33 = vld [vmem:[#allocation2 + $0x88] sm:$0xf0]  ;;  %v3618_v37 = vld [vmem:[#allocation2 + $0x128] sm:$0xf]  ;;  %v3823_v48 = vor.u32 %v5104_v40, %v3822_v39  ;;  %v5026_v61 = vld [vmem:[#allocation2 + $0x58] sm:$0xf0] }
  0x5d   :  { %1227 = vmatpush.bf16.msra.mxu0 %v3723_v52  ;;  %v5111_v52 = vld [vmem:[#allocation2 + $0x304] sm:$0xf]  ;;  %v3498_v9 = vld [vmem:[#allocation2 + $0x38] sm:$0xf]  ;;  %v3582_v13 = vld [vmem:[#allocation2 + $0xe0] sm:$0xf] }
  0x5e   :  { %1240 = vmatpush.bf16.msra.mxu1 %v3819_v54  ;;  %v3852_v54 = vld [vmem:[#allocation2 + $0x30c] sm:$0xf0]  ;;  %v3678_v18 = vld [vmem:[#allocation2 + $0x1a0] sm:$0xf]  ;;  %v5068_v20 = vld [vmem:[#allocation2 + $0x1a8] sm:$0xf0] }
  0x5f   :  { %1265 = vmatpush.bf16.msrb.mxu2 %v4023_v51  ;;  %v3756_v51 = vld [vmem:[#allocation2 + $0x24c] sm:$0xf0] }
  0x60   :  { %1253 = vmatpush.bf16.msra.mxu3 %v3915_v58  ;;  %v3963_v58 = vor.u32 %v5138_v42, %v3960_v43  ;;  %v3759_v0 = vor.u32 %v5087_v49, %v3756_v51  ;;  %v3714_v42 = vld [vmem:[#allocation2 + $0x1e8] sm:$0xf]  ;;  %v5077_v43 = vld [vmem:[#allocation2 + $0x1f0] sm:$0xf0] }
  0x61   :  { %1228 = vmatpush.bf16.msra.mxu0 %v3711_v2  ;;  %v3855_v2 = vor.u32 %v5111_v52, %v3852_v54  ;;  %v3715_v51 = vor.u32 %v5077_v43, %v3714_v42  ;;  %v3810_v52 = vld [vmem:[#allocation2 + $0x2a8] sm:$0xf]  ;;  %v5101_v54 = vld [vmem:[#allocation2 + $0x2b0] sm:$0xf0] }
  0x62   :  { %1241 = vmatpush.bf16.msra.mxu1 %v3807_v3  ;;  %v3948_v3 = vld [vmem:[#allocation2 + $0x3cc] sm:$0xf0]  ;;  %v3811_v62 = vor.u32 %v5101_v54, %v3810_v52  ;;  %v3474_v42 = vld [vmem:[#allocation2 + $0x8] sm:$0xf]  ;;  %v5017_v43 = vld [vmem:[#allocation2 + $0x10] sm:$0xf0] }
  0x63   :  { %1266 = vmatpush.bf16.msrb.mxu2 %v4011_v1  ;;  %v5135_v1 = vld [vmem:[#allocation2 + $0x3c4] sm:$0xf]  ;;  %v3762_v52 = vld [vmem:[#allocation2 + $0x248] sm:$0xf]  ;;  %v5089_v54 = vld [vmem:[#allocation2 + $0x250] sm:$0xf0] }
  0x64   :  { %1254 = vmatpush.bf16.msra.mxu3 %v3903_v8  ;;  %v3655_v8 = vor.u32 %v5062_v59, %v3654_v55  ;;  %v5050_v55 = vld [vmem:[#allocation2 + $0x118] sm:$0xf0]  ;;  %v3510_v59 = vld [vmem:[#allocation2 + $0x50] sm:$0xf] }
  0x65   :  { %1229 = vmatpush.bf16.msra.mxu0 %v3699_v15  ;;  %v5083_v15 = vld [vmem:[#allocation2 + $0x220] sm:$0xf0] }
  0x66   :  { %1242 = vmatpush.bf16.msra.mxu1 %v3795_v16  ;;  %v3951_v16 = vor.u32 %v5135_v1, %v3948_v3  ;;  %v3703_v1 = vor.u32 %v5074_v57, %v3702_v56  ;;  %v5098_v3 = vld [vmem:[#allocation2 + $0x298] sm:$0xf0] }
  0x67   :  { %1267 = vmatpush.bf16.msrb.mxu2 %v3999_v14  ;;  %v3738_v14 = vld [vmem:[#allocation2 + $0x218] sm:$0xf] }
  0x68   :  { %1255 = vmatpush.bf16.msra.mxu3 %v3891_v21  ;;  %v3847_v21 = vor.u32 %v5110_v12, %v3846_v11  ;;  %v3739_v24 = vor.u32 %v5083_v15, %v3738_v14  ;;  %v3691_v14 = vor.u32 %v5071_v7, %v3690_v6  ;;  %v3786_v15 = vld [vmem:[#allocation2 + $0x278] sm:$0xf]  ;;  %v3918_v6 = vld [vmem:[#allocation2 + $0x380] sm:$0xf]  ;;  %v5128_v7 = vld [vmem:[#allocation2 + $0x388] sm:$0xf0] }
  0x69   :  { %1230 = vmatpush.bf16.msra.mxu0 %v3687_v28  ;;  %v3726_v28 = vld [vmem:[#allocation2 + $0x200] sm:$0xf] }
  0x6a   :  { %1243 = vmatpush.bf16.msra.mxu1 %v3783_v29  ;;  %v5080_v29 = vld [vmem:[#allocation2 + $0x208] sm:$0xf0] }
  0x6b   :  { %1268 = vmatpush.bf16.msrb.mxu2 %v3987_v27  ;;  %v5056_v27 = vld [vmem:[#allocation2 + $0x148] sm:$0xf0]  ;;  %v3727_v38 = vor.u32 %v5080_v29, %v3726_v28  ;;  %v3679_v28 = vor.u32 %v5068_v20, %v3678_v18  ;;  %v3774_v29 = vld [vmem:[#allocation2 + $0x260] sm:$0xf]  ;;  %v3894_v18 = vld [vmem:[#allocation2 + $0x350] sm:$0xf] }
  0x6c   :  { %1256 = vmatpush.bf16.msra.mxu3 %v3879_v34  ;;  %v3835_v34 = vor.u32 %v5107_v26, %v3834_v25  ;;  %v3631_v36 = vor.u32 %v5056_v27, %v3630_v23  ;;  %v5020_v23 = vld [vmem:[#allocation2 + $0x28] sm:$0xf0]  ;;  %v5041_v27 = vld [vmem:[#allocation2 + $0xd0] sm:$0xf0]  ;;  %v5122_v20 = vld [vmem:[#allocation2 + $0x358] sm:$0xf0] }
  0x6d   :  { %1231 = vmatpush.bf16.msra.mxu0 %v3675_v44  ;;  %v3535_v44 = vor.u32 %v5032_v33, %v3534_v32  ;;  %v4038_v32 = vld [vmem:[#allocation2 + $0x470] sm:$0xf]  ;;  %v3666_v33 = vld [vmem:[#allocation2 + $0x188] sm:$0xf] }
  0x6e   :  { %1244 = vmatpush.bf16.msra.mxu1 %v3771_v46  ;;  %v3522_v46 = vld [vmem:[#allocation2 + $0x68] sm:$0xf] }
  0x6f   :  { %1269 = vmatpush.bf16.msrb.mxu2 %v3975_v41  ;;  %v5053_v41 = vld [vmem:[#allocation2 + $0x130] sm:$0xf0] }
  0x70   :  { %1257 = vmatpush.bf16.msra.mxu3 %v3867_v50  ;;  %v3619_v49 = vor.u32 %v5053_v41, %v3618_v37  ;;  %v3606_v50 = vld [vmem:[#allocation2 + $0x110] sm:$0xf]  ;;  %v4050_v37 = vld [vmem:[#allocation2 + $0x488] sm:$0xf] }
  0x71   :  { %1232 = vmatpush.bf16.msra.mxu0 %v3663_v63  ;;  %v3607_v63 = vor.u32 %v5050_v55, %v3606_v50  ;;  %v3475_v55 = vor.u32 %v5017_v43, %v3474_v42  ;;  %v4093_v42 = vld [vmem:[#allocation4 + $0x48] sm:$0xf]  ;;  %v5172_v43 = vld [vmem:[#allocation4 + $0x50] sm:$0xf0] }
  0x72   :  { %1245 = vmatpush.bf16.msra.mxu1 %v3759_v0  ;;  %v3594_v0 = vld [vmem:[#allocation2 + $0xf8] sm:$0xf] }
  0x73   :  { %1270 = vmatpush.bf16.msrb.mxu2 %v3963_v58  ;;  %v3523_v58 = vor.u32 %v5029_v47, %v3522_v46  ;;  %v3942_v47 = vld [vmem:[#allocation2 + $0x3b0] sm:$0xf] }
  0x74   :  { %1258 = vmatpush.bf16.msra.mxu3 %v3855_v2  ;;  %1233 = vmatmul.bf16.vlgmr.msra.gmra.mxu0 %v5592_v53  ;;  %v3798_v2 = vld [vmem:[#allocation2 + $0x290] sm:$0xf] }
  0x75   :  { %1316 = vmatpush.bf16.msrb.mxu0 %v3751_v10  ;;  %1246 = vmatmul.bf16.vlgmr.msra.gmra.mxu1 %v5610_v19  ;;  %v5023_v10 = vld [vmem:[#allocation2 + $0x40] sm:$0xf0]  ;;  %v3799_v11 = vor.u32 %v5098_v3, %v3798_v2 }
  0x76   :  { %1284 = vmatpush.bf16.msrb.mxu1 %v4047_v4  ;;  %v5047_v4 = vld [vmem:[#allocation2 + $0x100] sm:$0xf0] }
  0x77   :  { %1259 = vmatmul.bf16.vlgmr.msra.gmra.mxu3 %v5626_v30  ;;  %1271 = vmatpush.bf16.msrb.mxu2 %v3951_v16  ;;  %v3595_v12 = vor.u32 %v5047_v4, %v3594_v0  ;;  %v5095_v16 = vld [vmem:[#allocation2 + $0x280] sm:$0xf0]  ;;  %v4141_v0 = vld [vmem:[#allocation4 + $0xa8] sm:$0xf] }
  0x78   :  { %1303 = vmatpush.bf16.msrb.mxu3 %v3655_v8  ;;  %v3511_v8 = vor.u32 %v5026_v61, %v3510_v59  ;;  %v3787_v25 = vor.u32 %v5095_v16, %v3786_v15  ;;  %v5131_v59 = vld [vmem:[#allocation2 + $0x3a0] sm:$0xf0]  ;;  %v3763_v61 = vor.u32 %v5089_v54, %v3762_v52  ;;  %v3990_v15 = vld [vmem:[#allocation2 + $0x410] sm:$0xf]  ;;  %v5146_v16 = vld [vmem:[#allocation2 + $0x418] sm:$0xf0] }
  0x79   :  { %1317 = vmatpush.bf16.msrb.mxu0 %v3739_v24  ;;  %v3570_v24 = vld [vmem:[#allocation2 + $0xc8] sm:$0xf]  ;;  %v4131_v54 = vld [vmem:[#allocation4 + $0x9c] sm:$0xf0] }
  0x7a   :  { %1290 = vmatpush.bf16.msra.mxu1 %v3559_v17  ;;  %1272 = vmatmul.bf16.vlgmr.msrb.gmra.mxu2 %v5628_v35  ;;  %v5044_v17 = vld [vmem:[#allocation2 + $0xe8] sm:$0xf0]  ;;  %v3571_v41 = vor.u32 %v5041_v27, %v3570_v24  ;;  %v3895_v24 = vor.u32 %v5122_v20, %v3894_v18  ;;  %v5175_v27 = vld [vmem:[#allocation4 + $0x68] sm:$0xf0]  ;;  %v4237_v18 = vld [vmem:[#allocation4 + $0x168] sm:$0xf] }
  0x7b   :  { %1329 = vmatpush.bf16.msra.mxu2 %v3847_v21  ;;  %v3499_v21 = vor.u32 %v5023_v10, %v3498_v9  ;;  %v3583_v26 = vor.u32 %v5044_v17, %v3582_v13  ;;  %v5149_v9 = vld [vmem:[#allocation2 + $0x430] sm:$0xf0]  ;;  %v3919_v10 = vor.u32 %v5128_v7, %v3918_v6  ;;  %v4095_v6 = vld [vmem:[#allocation4 + $0x54] sm:$0xf0]  ;;  %v5208_v20 = vld [vmem:[#allocation4 + $0x170] sm:$0xf0] }
  0x7c   :  { %1304 = vmatpush.bf16.msrb.mxu3 %v3643_v22  ;;  %v3486_v22 = vld [vmem:[#allocation2 + $0x20] sm:$0xf]  ;;  %v5125_v13 = vld [vmem:[#allocation2 + $0x370] sm:$0xf0]  ;;  %v4069_v7 = vld [vmem:[#allocation4 + $0x18] sm:$0xf] }
  0x7d   :  { %1318 = vmatpush.bf16.msrb.mxu0 %v3727_v38  ;;  %v5161_v38 = vld [vmem:[#allocation2 + $0x490] sm:$0xf0]  ;;  %v3487_v39 = vor.u32 %v5020_v23, %v3486_v22  ;;  %v5143_v22 = vld [vmem:[#allocation2 + $0x400] sm:$0xf0]  ;;  %v4117_v23 = vld [vmem:[#allocation4 + $0x78] sm:$0xf] }
  0x7e   :  { %1291 = vmatpush.bf16.msra.mxu1 %v3547_v31  ;;  %v5092_v31 = vld [vmem:[#allocation2 + $0x268] sm:$0xf0]  ;;  %v4051_v50 = vor.u32 %v5161_v38, %v4050_v37  ;;  %v3870_v38 = vld [vmem:[#allocation2 + $0x320] sm:$0xf] }
  0x7f   :  { %1330 = vmatpush.bf16.msra.mxu2 %v3835_v34  ;;  %v5065_v34 = vld [vmem:[#allocation2 + $0x190] sm:$0xf0]  ;;  %v3775_v40 = vor.u32 %v5092_v31, %v3774_v29  ;;  %v3882_v29 = vld [vmem:[#allocation2 + $0x338] sm:$0xf]  ;;  %v5119_v31 = vld [vmem:[#allocation2 + $0x340] sm:$0xf0] }
  0x80   :  { %1305 = vmatpush.bf16.msrb.mxu3 %v3631_v36  ;;  %v5158_v36 = vld [vmem:[#allocation2 + $0x478] sm:$0xf0] }
  0x81   :  { %1319 = vmatpush.bf16.msrb.mxu0 %v3715_v51  ;;  %v4039_v46 = vor.u32 %v5158_v36, %v4038_v32  ;;  %v5155_v51 = vld [vmem:[#allocation2 + $0x460] sm:$0xf0]  ;;  %v3966_v32 = vld [vmem:[#allocation2 + $0x3e0] sm:$0xf]  ;;  %v3883_v36 = vor.u32 %v5119_v31, %v3882_v29  ;;  %v5204_v29 = vld [vmem:[#allocation4 + $0x154] sm:$0xf] }
  0x82   :  { %1292 = vmatpush.bf16.msra.mxu1 %v3535_v44  ;;  %v3667_v44 = vor.u32 %v5065_v34, %v3666_v33  ;;  %v5140_v33 = vld [vmem:[#allocation2 + $0x3e8] sm:$0xf0]  ;;  %v4227_v31 = vld [vmem:[#allocation4 + $0x15c] sm:$0xf0] }
  0x83   :  { %1331 = vmatpush.bf16.msra.mxu2 %v3823_v48  ;;  %v5134_v48 = vld [vmem:[#allocation2 + $0x3b8] sm:$0xf0]  ;;  %v3967_v37 = vor.u32 %v5140_v33, %v3966_v32 }
  0x84   :  { %1306 = vmatpush.bf16.msrb.mxu3 %v3619_v49  ;;  %v4026_v49 = vld [vmem:[#allocation2 + $0x458] sm:$0xf]  ;;  %v3943_v56 = vor.u32 %v5134_v48, %v3942_v47  ;;  %v4094_v47 = vor.u32 %v5172_v43, %v4093_v42  ;;  %v5162_v33 = vld [vmem:[#allocation4 + $0x4] sm:$0xf] }
  0x85   :  { %1320 = vmatpush.bf16.msrb.mxu0 %v3703_v1  ;;  %4053 = vmatmul.msk.bf16.vlgmr.msrb.gmra.mxu1 %vm1104_vm0, %v5616_v45  ;;  %v4027_v57 = vor.u32 %v5155_v51, %v4026_v49  ;;  %v5184_v1 = vld [vmem:[#allocation4 + $0xb0] sm:$0xf0]  ;;  %v5113_v51 = vld [vmem:[#allocation2 + $0x310] sm:$0xf0] }
  0x86   :  { %1293 = vmatpush.bf16.msra.mxu1 %v3523_v58  ;;  %v3930_v58 = vld [vmem:[#allocation2 + $0x398] sm:$0xf]  ;;  %v4142_v3 = vor.u32 %v5184_v1, %v4141_v0  ;;  %v5169_v0 = vld [vmem:[#allocation4 + $0x38] sm:$0xf0] }
  0x87   :  { %1332 = vmatpush.bf16.msra.mxu2 %v3811_v62  ;;  %v4014_v62 = vld [vmem:[#allocation2 + $0x440] sm:$0xf]  ;;  %v3931_v2 = vor.u32 %v5131_v59, %v3930_v58 }
  0x88   :  { %1307 = vmatpush.bf16.msrb.mxu3 %v3607_v63  ;;  %v5152_v63 = vld [vmem:[#allocation2 + $0x448] sm:$0xf0]  ;;  %v4119_v58 = vld [vmem:[#allocation4 + $0x84] sm:$0xf0] }
  0x89   :  { %1321 = vmatpush.bf16.msrb.mxu0 %v3691_v14  ;;  %v4015_v4 = vor.u32 %v5152_v63, %v4014_v62  ;;  %v4107_v62 = vld [vmem:[#allocation4 + $0x6c] sm:$0xf0] }
  0x8a   :  { %1294 = vmatpush.bf16.msra.mxu1 %v3511_v8  ;;  %v4002_v8 = vld [vmem:[#allocation2 + $0x428] sm:$0xf] }
  0x8b   :  { %1333 = vmatpush.bf16.msra.mxu2 %v3799_v11  ;;  %v5181_v11 = vld [vmem:[#allocation4 + $0x98] sm:$0xf0]  ;;  %v4081_v63 = vld [vmem:[#allocation4 + $0x30] sm:$0xf] }
  0x8c   :  { %1308 = vmatpush.bf16.msrb.mxu3 %v3595_v12  ;;  %v4003_v12 = vor.u32 %v5149_v9, %v4002_v8  ;;  %v4082_v1 = vor.u32 %v5169_v0, %v4081_v63  ;;  %v5166_v8 = vld [vmem:[#allocation4 + $0x20] sm:$0xf0]  ;;  %v4201_v0 = vld [vmem:[#allocation4 + $0x120] sm:$0xf] }
  0x8d   :  { %1322 = vmatpush.bf16.msrb.mxu0 %v3679_v28  ;;  %v4070_v9 = vor.u32 %v5166_v8, %v4069_v7  ;;  %v4203_v7 = vld [vmem:[#allocation4 + $0x12c] sm:$0xf0]  ;;  %v4209_v8 = vld [vmem:[#allocation4 + $0x128] sm:$0xf] }
  0x8e   :  { %1295 = vmatpush.bf16.msra.mxu1 %v3499_v21  ;;  %v3978_v21 = vld [vmem:[#allocation2 + $0x3f8] sm:$0xf] }
  0x8f   :  { %1334 = vmatpush.bf16.msra.mxu2 %v3787_v25  ;;  %v3979_v28 = vor.u32 %v5143_v22, %v3978_v21  ;;  %v4238_v21 = vor.u32 %v5208_v20, %v4237_v18  ;;  %v5207_v22 = vld [vmem:[#allocation4 + $0x16c] sm:$0xf] }
  0x90   :  { %1309 = vmatpush.bf16.msrb.mxu3 %v3583_v26  ;;  %v4105_v26 = vld [vmem:[#allocation4 + $0x60] sm:$0xf] }
  0x91   :  { %1323 = vmatpush.bf16.msrb.mxu0 %v3667_v44  ;;  %v4106_v34 = vor.u32 %v5175_v27, %v4105_v26  ;;  %v5183_v44 = vld [vmem:[#allocation4 + $0xac] sm:$0xf]  ;;  %v5205_v26 = vld [vmem:[#allocation4 + $0x158] sm:$0xf0] }
  0x92   :  { %1296 = vmatpush.bf16.msra.mxu1 %v3487_v39  ;;  %v5116_v39 = vld [vmem:[#allocation2 + $0x328] sm:$0xf0] }
  0x93   :  { %1335 = vmatpush.bf16.msra.mxu2 %v3775_v40  ;;  %v3954_v40 = vld [vmem:[#allocation2 + $0x3c8] sm:$0xf]  ;;  %v3871_v48 = vor.u32 %v5116_v39, %v3870_v38  ;;  %v5209_v38 = vld [vmem:[#allocation4 + $0x178] sm:$0xf0] }
  0x94   :  { %1310 = vmatpush.bf16.msrb.mxu3 %v3571_v41  ;;  %1324 = vmatmul.bf16.vlgmr.msrb.gmra.mxu0 %v5592_v53  ;;  %v3906_v53 = vld [vmem:[#allocation2 + $0x368] sm:$0xf]  ;;  %v5137_v41 = vld [vmem:[#allocation2 + $0x3d0] sm:$0xf0] }
  0x95   :  { %1375 = vmatpush.bf16.msra.mxu0 %v4051_v50  ;;  %v3907_v17 = vor.u32 %v5125_v13, %v3906_v53  ;;  %v3955_v49 = vor.u32 %v5137_v41, %v3954_v40  ;;  %v3858_v50 = vld [vmem:[#allocation2 + $0x308] sm:$0xf]  ;;  %v5651_v13 = vld [vmem:[%s5786_s2] sm:$0x7] }
  0x96   :  { %1297 = vmatpush.bf16.msra.mxu1 %v3475_v55  ;;  %v3859_v55 = vor.u32 %v5113_v51, %v3858_v50 }
  0x97   :  { %1311 = vmatmul.bf16.vlgmr.msrb.gmra.mxu3 %v5604_v5  ;;  %1336 = vmatpush.bf16.msra.mxu2 %v3763_v61  ;;  %v4129_v5 = vld [vmem:[#allocation4 + $0x90] sm:$0xf]  ;;  %v5174_v61 = vld [vmem:[#allocation4 + $0x64] sm:$0xf] }
  0x98   :  { %1355 = vmatpush.bf16.msra.mxu3 %v4039_v46  ;;  %v4130_v14 = vor.u32 %v5181_v11, %v4129_v5  ;;  %v4143_v46 = vld [vmem:[#allocation4 + $0xb4] sm:$0xf0]  ;;  %v4083_v11 = vld [vmem:[#allocation4 + $0x3c] sm:$0xf0] }
  0x99   :  { %1298 = vmatmul.bf16.vlgmr.msra.gmra.mxu1 %v5597_v60  ;;  %v3991_v60 = vor.u32 %v5146_v16, %v3990_v15  ;;  %v4146_v52 = vor.u32 %v5183_v44, %v4143_v46  ;;  %v5165_v16 = vld [vmem:[#allocation4 + $0x1c] sm:$0xf]  ;;  %1888 = vmatpush.bf16.msrb.mxu0 %v4238_v21  ;;  %v4233_v44 = vld [vmem:[#allocation4 + $0x158] sm:$0xf]  ;;  %v5206_v46 = vld [vmem:[#allocation4 + $0x160] sm:$0xf0] }
  0x9a   :  { %1342 = vmatpush.bf16.msrb.mxu1 %v3943_v56  ;;  %1337 = vmatmul.bf16.vlgmr.msra.gmra.mxu2 %v5610_v19  ;;  %v5178_v19 = vld [vmem:[#allocation4 + $0x80] sm:$0xf0] }
  0x9b   :  { %1875 = vmatpush.bf16.msrb.mxu2 %v4142_v3  ;;  %v4118_v25 = vor.u32 %v5178_v19, %v4117_v23  ;;  %v5171_v3 = vld [vmem:[#allocation4 + $0x4c] sm:$0xf]  ;;  %v4239_v23 = vld [vmem:[#allocation4 + $0x174] sm:$0xf0]  ;;  %v314_v19 = vperm.slane %v5651_v13, 0 }
  0x9c   :  { %1356 = vmatpush.bf16.msra.mxu3 %v4027_v57  ;;  %v5177_v57 = vld [vmem:[#allocation4 + $0x7c] sm:$0xf] }
  0x9d   :  { %v4122_v59 = vor.u32 %v5177_v57, %v4119_v58  ;;  %v4215_v57 = vld [vmem:[#allocation4 + $0x144] sm:$0xf0]  ;;  %v4221_v58 = vld [vmem:[#allocation4 + $0x140] sm:$0xf] }
  0x9e   :  { %1343 = vmatpush.bf16.msrb.mxu1 %v3931_v2  ;;  %v4110_v2 = vor.u32 %v5174_v61, %v4107_v62 }
  0x9f   :  { %1876 = vmatpush.bf16.msrb.mxu2 %v4130_v14 }
  0xa0   :  { %1357 = vmatpush.bf16.msra.mxu3 %v4015_v4 }
  0xa2   :  { %1344 = vmatpush.bf16.msrb.mxu1 %v3919_v10  ;;  %v5168_v10 = vld [vmem:[#allocation4 + $0x34] sm:$0xf] }
  0xa3   :  { %1877 = vmatpush.bf16.msrb.mxu2 %v4118_v25  ;;  %v4086_v15 = vor.u32 %v5168_v10, %v4083_v11  ;;  %v4225_v25 = vld [vmem:[#allocation4 + $0x150] sm:$0xf] }
  0xa4   :  { %1358 = vmatpush.bf16.msra.mxu3 %v4003_v12  ;;  %4054 = vmatmul.msk.bf16.vlgmr.msra.gmra.mxu0 %vm1104_vm0, %v5616_v45  ;;  %v5180_v45 = vld [vmem:[#allocation4 + $0x94] sm:$0xf]  ;;  %v5163_v12 = vld [vmem:[#allocation4 + $0x8] sm:$0xf0] }
  0xa5   :  { %v4134_v56 = vor.u32 %v5180_v45, %v4131_v54  ;;  %v5202_v45 = vld [vmem:[#allocation4 + $0x140] sm:$0xf0]  ;;  %v5201_v54 = vld [vmem:[#allocation4 + $0x13c] sm:$0xf] }
  0xa6   :  { %1345 = vmatpush.bf16.msrb.mxu1 %v3907_v17  ;;  %v4218_v61 = vor.u32 %v5201_v54, %v4215_v57  ;;  %v5188_v54 = vld [vmem:[#allocation4 + $0xd0] sm:$0xf0] }
  0xa7   :  { %1878 = vmatpush.bf16.msrb.mxu2 %v4106_v34  ;;  %v4059_v34 = vld [vmem:[#allocation4 + $0xc] sm:$0xf0] }
  0xa8   :  { %1359 = vmatpush.bf16.msra.mxu3 %v3991_v60  ;;  %v4071_v60 = vld [vmem:[#allocation4 + $0x24] sm:$0xf0]  ;;  %v4062_v42 = vor.u32 %v5162_v33, %v4059_v34 }
  0xa9   :  { %v4074_v27 = vor.u32 %v5165_v16, %v4071_v60  ;;  %v4191_v16 = vld [vmem:[#allocation4 + $0x114] sm:$0xf0]  ;;  %v5197_v60 = vld [vmem:[#allocation4 + $0x118] sm:$0xf0] }
  0xaa   :  { %1346 = vmatpush.bf16.msrb.mxu1 %v3895_v24  ;;  %v4242_v24 = vor.u32 %v5207_v22, %v4239_v23 }
  0xab   :  { %1879 = vmatpush.bf16.msrb.mxu2 %v4094_v47 }
  0xac   :  { %1360 = vmatpush.bf16.msra.mxu3 %v3979_v28  ;;  %v4226_v28 = vor.u32 %v5205_v26, %v4225_v25  ;;  %v5192_v25 = vld [vmem:[#allocation4 + $0xf4] sm:$0xf] }
  0xae   :  { %1347 = vmatpush.bf16.msrb.mxu1 %v3883_v36  ;;  %v4230_v36 = vor.u32 %v5204_v29, %v4227_v31  ;;  %1889 = vmatpush.bf16.msrb.mxu0 %v4226_v28  ;;  %v4179_v29 = vld [vmem:[#allocation4 + $0xfc] sm:$0xf0]  ;;  %v4185_v31 = vld [vmem:[#allocation4 + $0xf8] sm:$0xf] }
  0xaf   :  { %1880 = vmatpush.bf16.msrb.mxu2 %v4082_v1  ;;  %v5199_v1 = vld [vmem:[#allocation4 + $0x128] sm:$0xf0]  ;;  %v4182_v34 = vor.u32 %v5192_v25, %v4179_v29  ;;  %v4329_v25 = vld [vmem:[#allocation4 + $0x218] sm:$0xf]  ;;  %v5230_v29 = vld [vmem:[#allocation4 + $0x220] sm:$0xf0] }
  0xb0   :  { %1361 = vmatpush.bf16.msra.mxu3 %v3967_v37  ;;  %v4245_v37 = vld [vmem:[#allocation4 + $0x170] sm:$0xf] }
  0xb1   :  { %v1117_v4 = vpop.f32.mrf.mxu0  ;;  %v4246_v43 = vor.u32 %v5209_v38, %v4245_v37  ;;  %v4165_v37 = vld [vmem:[#allocation4 + $0xd8] sm:$0xf]  ;;  %v5190_v38 = vld [vmem:[#allocation4 + $0xe0] sm:$0xf0] }
  0xb2   :  { %1348 = vmatpush.bf16.msrb.mxu1 %v3871_v48  ;;  %v1130_v5 = vpop.f32.mrf.mxu1  ;;  %v1118_v39 = vadd.f32 %v1117_v4, %v314_v19  ;;  %v4234_v48 = vor.u32 %v5206_v46, %v4233_v44  ;;  %v4177_v19 = vld [vmem:[#allocation4 + $0xf0] sm:$0xf] }
  0xb3   :  { %1881 = vmatpush.bf16.msrb.mxu2 %v4070_v9  ;;  %v5200_v9 = vld [vmem:[#allocation4 + $0x130] sm:$0xf0] }
  0xb4   :  { %1362 = vmatpush.bf16.msra.mxu3 %v3955_v49  ;;  %v1131_v47 = vadd.f32 %v1130_v5, %v1118_v39  ;;  %v4210_v5 = vor.u32 %v5200_v9, %v4209_v8  ;;  %v5189_v39 = vld [vmem:[#allocation4 + $0xdc] sm:$0xf] }
  0xb6   :  { %1349 = vmatpush.bf16.msrb.mxu1 %v3859_v55 }
  0xb7   :  { %1363 = vmatmul.bf16.vlgmr.msra.gmra.mxu3 %v5628_v35  ;;  %v4098_v35 = vor.u32 %v5171_v3, %v4095_v6  ;;  %v4202_v6 = vor.u32 %v5199_v1, %v4201_v0  ;;  %v5229_v0 = vld [vmem:[#allocation4 + $0x218] sm:$0xf0] }
  0xb8   :  { %1914 = vmatpush.bf16.msrb.mxu3 %v4146_v52  ;;  %v4213_v52 = vld [vmem:[#allocation4 + $0x138] sm:$0xf] }
  0xb9   :  { %1350 = vmatmul.bf16.vlgmr.msrb.gmra.mxu1 %v5626_v30  ;;  %v4057_v30 = vld [vmem:[#allocation4] sm:$0xf]  ;;  %v1143_v14 = vpop.f32.mrf.mxu2  ;;  %v1119_v17 = vpop.f32.mrf.mxu0 }
  0xba   :  { %v4058_v53 = vor.u32 %v5163_v12, %v4057_v30  ;;  %v1132_v32 = vpop.f32.mrf.mxu1  ;;  %v1156_v40 = vpop.f32.mrf.mxu3  ;;  %v1144_v49 = vadd.f32 %v1143_v14, %v1131_v47  ;;  %v4189_v30 = vld [vmem:[#allocation4 + $0x108] sm:$0xf]  ;;  %v5196_v12 = vld [vmem:[#allocation4 + $0x110] sm:$0xf0]  ;;  %v4197_v17 = vld [vmem:[#allocation4 + $0x110] sm:$0xf] }
  0xbb   :  { %v4198_v20 = vor.u32 %v5197_v60, %v4197_v17  ;;  %v5194_v32 = vld [vmem:[#allocation4 + $0x100] sm:$0xf0]  ;;  %v5233_v60 = vld [vmem:[#allocation4 + $0x238] sm:$0xf0] }
  0xbc   :  { %1915 = vmatpush.bf16.msrb.mxu3 %v4134_v56  ;;  %1882 = vmatpush.bf16.msrb.mxu2 %v4058_v53  ;;  %v1157_v55 = vadd.f32 %v1156_v40, %v1144_v49  ;;  %v4214_v56 = vor.u32 %v5202_v45, %v4213_v52  ;;  %v5195_v53 = vld [vmem:[#allocation4 + $0x10c] sm:$0xf]  ;;  %v4166_v40 = vor.u32 %v5190_v38, %v4165_v37  ;;  %v4155_v52 = vld [vmem:[#allocation4 + $0xcc] sm:$0xf0]  ;;  %v4161_v45 = vld [vmem:[#allocation4 + $0xc8] sm:$0xf] }
  0xbd   :  { %v4194_v18 = vor.u32 %v5195_v53, %v4191_v16  ;;  %v5187_v49 = vld [vmem:[#allocation4 + $0xc8] sm:$0xf0]  ;;  %v4162_v57 = vor.u32 %v5188_v54, %v4161_v45  ;;  %v4335_v53 = vld [vmem:[#allocation4 + $0x234] sm:$0xf0]  ;;  %v4311_v38 = vld [vmem:[#allocation4 + $0x204] sm:$0xf0] }
  0xbe   :  { %1890 = vmatpush.bf16.msrb.mxu0 %v4214_v56  ;;  %v4305_v45 = vld [vmem:[#allocation4 + $0x1e8] sm:$0xf]  ;;  %v5224_v54 = vld [vmem:[#allocation4 + $0x1f0] sm:$0xf0] }
  0xc0   :  { %1916 = vmatpush.bf16.msrb.mxu3 %v4122_v59  ;;  %1927 = vmatpush.bf16.msra.mxu2 %v4242_v24  ;;  %v5203_v59 = vld [vmem:[#allocation4 + $0x148] sm:$0xf0]  ;;  %v5193_v24 = vld [vmem:[#allocation4 + $0xf8] sm:$0xf0] }
  0xc1   :  { %v1145_v41 = vpop.f32.mrf.mxu2  ;;  %v4222_v62 = vor.u32 %v5203_v59, %v4221_v58  ;;  %v4178_v28 = vor.u32 %v5193_v24, %v4177_v19  ;;  %v4333_v58 = vld [vmem:[#allocation4 + $0x228] sm:$0xf]  ;;  %v5232_v59 = vld [vmem:[#allocation4 + $0x230] sm:$0xf0]  ;;  %v4323_v24 = vld [vmem:[#allocation4 + $0x21c] sm:$0xf0] }
  0xc2   :  { %v1158_v50 = vpop.f32.mrf.mxu3  ;;  %1891 = vmatpush.bf16.msrb.mxu0 %v4202_v6  ;;  %v4167_v41 = vld [vmem:[#allocation4 + $0xe4] sm:$0xf0]  ;;  %v5228_v19 = vld [vmem:[#allocation4 + $0x214] sm:$0xf] }
  0xc3   :  { %v4170_v44 = vor.u32 %v5189_v39, %v4167_v41  ;;  %v5186_v50 = vld [vmem:[#allocation4 + $0xc4] sm:$0xf]  ;;  %v4317_v39 = vld [vmem:[#allocation4 + $0x200] sm:$0xf] }
  0xc4   :  { %1917 = vmatpush.bf16.msrb.mxu3 %v4110_v2  ;;  %1928 = vmatpush.bf16.msra.mxu2 %v4230_v36  ;;  %v5198_v2 = vld [vmem:[#allocation4 + $0x124] sm:$0xf]  ;;  %v4186_v36 = vor.u32 %v5194_v32, %v4185_v31  ;;  %v4158_v56 = vor.u32 %v5186_v50, %v4155_v52  ;;  %v4330_v32 = vor.u32 %v5230_v29, %v4329_v25 }
  0xc5   :  { %v4206_v10 = vor.u32 %v5198_v2, %v4203_v7  ;;  %v4309_v2 = vld [vmem:[#allocation4 + $0x1f8] sm:$0xf]  ;;  %v5210_v29 = vld [vmem:[#allocation4 + $0x184] sm:$0xf] }
  0xc8   :  { %1918 = vmatpush.bf16.msrb.mxu3 %v4098_v35  ;;  %1929 = vmatpush.bf16.msra.mxu2 %v4218_v61  ;;  %v4321_v61 = vld [vmem:[#allocation4 + $0x210] sm:$0xf] }
  0xc9   :  { %v1195_v51 = vpop.f32.mrf.mxu2  ;;  %v4322_v1 = vor.u32 %v5229_v0, %v4321_v61  ;;  %v4287_v61 = vld [vmem:[#allocation4 + $0x1d4] sm:$0xf0]  ;;  %v5185_v0 = vld [vmem:[#allocation4 + $0xb8] sm:$0xf0] }
  0xcc   :  { %1919 = vmatpush.bf16.msrb.mxu3 %v4086_v15  ;;  %1930 = vmatpush.bf16.msra.mxu2 %v4206_v10  ;;  %v4190_v15 = vor.u32 %v5196_v12, %v4189_v30  ;;  %v4297_v10 = vld [vmem:[#allocation4 + $0x1e0] sm:$0xf]  ;;  %v5231_v12 = vld [vmem:[#allocation4 + $0x22c] sm:$0xf] }
  0xcd   :  { %v4338_v17 = vor.u32 %v5231_v12, %v4335_v53  ;;  %v5182_v12 = vld [vmem:[#allocation4 + $0xa0] sm:$0xf0]  ;;  %v4281_v53 = vld [vmem:[#allocation4 + $0x1b8] sm:$0xf] }
  0xce   :  { %1892 = vmatpush.bf16.msrb.mxu0 %v4190_v15 }
  0xd0   :  { %1920 = vmatpush.bf16.msrb.mxu3 %v4074_v27  ;;  %1931 = vmatpush.bf16.msra.mxu2 %v4194_v18  ;;  %v4285_v18 = vld [vmem:[#allocation4 + $0x1c8] sm:$0xf] }
  0xd1   :  { %v1169_v63 = vpop.f32.mrf.mxu0  ;;  %v1197_v35 = vpop.f32.mrf.mxu2 }
  0xd2   :  { %v1170_v3 = vadd.f32 %v1169_v63, %v1157_v55  ;;  %v1182_v4 = vpop.f32.mrf.mxu1  ;;  %1893 = vmatpush.bf16.msrb.mxu0 %v4178_v28  ;;  %v4334_v63 = vor.u32 %v5232_v59, %v4333_v58  ;;  %v4326_v28 = vor.u32 %v5228_v19, %v4323_v24  ;;  %v5211_v58 = vld [vmem:[#allocation4 + $0x188] sm:$0xf0]  ;;  %v4269_v19 = vld [vmem:[#allocation4 + $0x1a0] sm:$0xf] }
  0xd3   :  { %v5219_v59 = vld [vmem:[#allocation4 + $0x1cc] sm:$0xf] }
  0xd4   :  { %1921 = vmatpush.bf16.msrb.mxu3 %v4062_v42  ;;  %v1183_v11 = vadd.f32 %v1182_v4, %v1170_v3  ;;  %1932 = vmatpush.bf16.msra.mxu2 %v4182_v34  ;;  %v4173_v42 = vld [vmem:[#allocation4 + $0xe0] sm:$0xf]  ;;  %v5226_v3 = vld [vmem:[#allocation4 + $0x200] sm:$0xf0]  ;;  %v5217_v34 = vld [vmem:[#allocation4 + $0x1b8] sm:$0xf0] }
  0xd5   :  { %1901 = vmatpush.bf16.msra.mxu1 %v4334_v63  ;;  %v4310_v6 = vor.u32 %v5226_v3, %v4309_v2  ;;  %v4149_v63 = vld [vmem:[#allocation4 + $0xb0] sm:$0xf]  ;;  %v5215_v24 = vld [vmem:[#allocation4 + $0x1a8] sm:$0xf0] }
  0xd6   :  { %v1196_v14 = vadd.f32 %v1195_v51, %v1183_v11  ;;  %1894 = vmatpush.bf16.msrb.mxu0 %v4166_v40  ;;  %v5227_v40 = vld [vmem:[#allocation4 + $0x208] sm:$0xf0] }
  0xd8   :  { %1966 = vmatpush.bf16.msra.mxu3 %v4246_v43  ;;  %v1381_v21 = vmax.f32 %v1196_v14, 0.0  ;;  %v5191_v43 = vld [vmem:[#allocation4 + $0xe8] sm:$0xf0]  ;;  %1933 = vmatpush.bf16.msra.mxu2 %v4170_v44  ;;  %v4341_v14 = vld [vmem:[#allocation4 + $0x230] sm:$0xf] }
  0xd9   :  { %v1171_v23 = vpop.f32.mrf.mxu0  ;;  %v4174_v46 = vor.u32 %v5191_v43, %v4173_v42  ;;  %1902 = vmatpush.bf16.msra.mxu1 %v4322_v1  ;;  %v4261_v42 = vld [vmem:[#allocation4 + $0x198] sm:$0xf]  ;;  %v5214_v43 = vld [vmem:[#allocation4 + $0x1a0] sm:$0xf0]  ;;  %v4306_v1 = vor.u32 %v5224_v54, %v4305_v45  ;;  %v5167_v45 = vld [vmem:[#allocation4 + $0x28] sm:$0xf0] }
  0xda   :  { %v1208_v22 = vpop.f32.mrf.mxu3  ;;  %v5654_v26 = vpack.c.bf16 %v1381_v21, %v1381_v21  ;;  %v1184_v27 = vpop.f32.mrf.mxu1 }
  0xdc   :  { %1967 = vmatpush.bf16.msra.mxu3 %v4234_v48  ;;  %1883 = vmatmul.bf16.vlgmr.msrb.gmra.mxu2 %v5654_v26  ;;  %v4153_v48 = vld [vmem:[#allocation4 + $0xc0] sm:$0xf] }
  0xdd   :  { %v1221_v33 = vpop.f32.mrf.mxu2  ;;  %1922 = vmatmul.bf16.vlgmr.msrb.gmra.mxu3 %v5654_v26  ;;  %v4154_v51 = vor.u32 %v5187_v49, %v4153_v48  ;;  %1934 = vmatpush.bf16.msra.mxu2 %v4158_v56  ;;  %v5222_v48 = vld [vmem:[#allocation4 + $0x1e4] sm:$0xf]  ;;  %v4299_v49 = vld [vmem:[#allocation4 + $0x1ec] sm:$0xf0] }
  0xde   :  { %1903 = vmatpush.bf16.msra.mxu1 %v4310_v6  ;;  %v5221_v6 = vld [vmem:[#allocation4 + $0x1d8] sm:$0xf0] }
  0xdf   :  { %1895 = vmatpush.bf16.msrb.mxu0 %v4154_v51  ;;  %v4262_v51 = vor.u32 %v5214_v43, %v4261_v42  ;;  %v4101_v43 = vld [vmem:[#allocation4 + $0x50] sm:$0xf] }
  0xe0   :  { %1968 = vmatpush.bf16.msra.mxu3 %v4222_v62  ;;  %v315_v62 = vperm.slane %v5651_v13, 1 }
  0xe2   :  { %v1210_v47 = vpop.f32.mrf.mxu3  ;;  %v1209_v4 = vadd.f32 %v1208_v22, %v315_v62  ;;  %v4342_v22 = vor.u32 %v5233_v60, %v4341_v14  ;;  %v5218_v14 = vld [vmem:[#allocation4 + $0x1c0] sm:$0xf0]  ;;  %v5213_v60 = vld [vmem:[#allocation4 + $0x19c] sm:$0xf] }
  0xe3   :  { %1940 = vmatpush.bf16.msra.mxu0 %v4338_v17  ;;  %v4318_v47 = vor.u32 %v5227_v40, %v4317_v39 }
  0xe4   :  { %1969 = vmatpush.bf16.msra.mxu3 %v4210_v5  ;;  %v1222_v9 = vadd.f32 %v1221_v33, %v1209_v4  ;;  %v5223_v5 = vld [vmem:[#allocation4 + $0x1e8] sm:$0xf0]  ;;  %1979 = vmatpush.bf16.msrb.mxu2 %v4342_v22  ;;  %v4273_v33 = vld [vmem:[#allocation4 + $0x1b0] sm:$0xf] }
  0xe5   :  { %v1223_v55 = vpop.f32.mrf.mxu2  ;;  %v4298_v11 = vor.u32 %v5223_v5, %v4297_v10  ;;  %v4274_v37 = vor.u32 %v5217_v34, %v4273_v33  ;;  %v4293_v4 = vld [vmem:[#allocation4 + $0x1d0] sm:$0xf]  ;;  %v5216_v10 = vld [vmem:[#allocation4 + $0x1b4] sm:$0xf]  ;;  %v4275_v5 = vld [vmem:[#allocation4 + $0x1bc] sm:$0xf0] }
  0xe6   :  { %v4249_v55 = vld [vmem:[#allocation4 + $0x180] sm:$0xf]  ;;  %v5176_v34 = vld [vmem:[#allocation4 + $0x70] sm:$0xf0] }
  0xe7   :  { %1904 = vmatpush.bf16.msra.mxu1 %v4298_v11  ;;  %1941 = vmatpush.bf16.msra.mxu0 %v4326_v28  ;;  %v4250_v3 = vor.u32 %v5211_v58, %v4249_v55  ;;  %v4137_v11 = vld [vmem:[#allocation4 + $0x98] sm:$0xf]  ;;  %v4065_v58 = vld [vmem:[#allocation4 + $0x8] sm:$0xf] }
  0xe8   :  { %1970 = vmatpush.bf16.msra.mxu3 %v4198_v20  ;;  %v5220_v20 = vld [vmem:[#allocation4 + $0x1d0] sm:$0xf0]  ;;  %1980 = vmatpush.bf16.msrb.mxu2 %v4330_v32  ;;  %v4113_v32 = vld [vmem:[#allocation4 + $0x68] sm:$0xf] }
  0xe9   :  { %v4286_v23 = vor.u32 %v5220_v20, %v4285_v18  ;;  %v4263_v18 = vld [vmem:[#allocation4 + $0x1a4] sm:$0xf0]  ;;  %v4125_v20 = vld [vmem:[#allocation4 + $0x80] sm:$0xf] }
  0xea   :  { %v4266_v22 = vor.u32 %v5213_v60, %v4263_v18  ;;  %v4405_v60 = vld [vmem:[#allocation6 + $0x78] sm:$0xf]  ;;  %v5250_v18 = vld [vmem:[#allocation6 + $0x80] sm:$0xf0] }
  0xeb   :  { %1905 = vmatpush.bf16.msra.mxu1 %v4286_v23  ;;  %v5179_v23 = vld [vmem:[#allocation4 + $0x88] sm:$0xf0] }
  0xec   :  { %1971 = vmatpush.bf16.msra.mxu3 %v4186_v36  ;;  %v5225_v36 = vld [vmem:[#allocation4 + $0x1fc] sm:$0xf]  ;;  %1981 = vmatpush.bf16.msrb.mxu2 %v4318_v47  ;;  %v4126_v25 = vor.u32 %v5179_v23, %v4125_v20  ;;  %v4089_v47 = vld [vmem:[#allocation4 + $0x38] sm:$0xf]  ;;  %v4406_v20 = vor.u32 %v5250_v18, %v4405_v60 }
  0xed   :  { %v4314_v41 = vor.u32 %v5225_v36, %v4311_v38  ;;  %v4257_v36 = vld [vmem:[#allocation4 + $0x188] sm:$0xf]  ;;  %v4114_v38 = vor.u32 %v5176_v34, %v4113_v32  ;;  %v4431_v23 = vld [vmem:[#allocation6 + $0xb4] sm:$0xf0]  ;;  %v5252_v32 = vld [vmem:[#allocation6 + $0x94] sm:$0xf] }
  0xef   :  { %1906 = vmatpush.bf16.msra.mxu1 %v4274_v37  ;;  %1942 = vmatpush.bf16.msra.mxu0 %v4314_v41  ;;  %v5212_v37 = vld [vmem:[#allocation4 + $0x190] sm:$0xf0] }
  0xf0   :  { %1972 = vmatpush.bf16.msra.mxu3 %v4174_v46  ;;  %1982 = vmatpush.bf16.msrb.mxu2 %v4306_v1  ;;  %v4258_v39 = vor.u32 %v5212_v37, %v4257_v36  ;;  %v4369_v37 = vld [vmem:[#allocation6 + $0x30] sm:$0xf] }
  0xf1   :  { %v1234_v7 = vpop.f32.mrf.mxu0 }
  0xf2   :  { %v1247_v8 = vpop.f32.mrf.mxu1  ;;  %v1235_v35 = vadd.f32 %v1234_v7, %v1222_v9  ;;  %v4290_v7 = vor.u32 %v5219_v59, %v4287_v61  ;;  %v5164_v59 = vld [vmem:[#allocation4 + $0x10] sm:$0xf0] }
  0xf3   :  { %1907 = vmatpush.bf16.msra.mxu1 %v4262_v51  ;;  %v316_v51 = vperm.slane %v5651_v13, 2  ;;  %v4066_v61 = vor.u32 %v5164_v59, %v4065_v58  ;;  %v4489_v58 = vld [vmem:[#allocation6 + $0x120] sm:$0xf]  ;;  %v5271_v59 = vld [vmem:[#allocation6 + $0x128] sm:$0xf0] }
  0xf4   :  { %1973 = vmatpush.bf16.msra.mxu3 %v4162_v57  ;;  %v1248_v21 = vadd.f32 %v1247_v8, %v1235_v35  ;;  %v4302_v57 = vor.u32 %v5222_v48, %v4299_v49  ;;  %v4150_v8 = vor.u32 %v5185_v0, %v4149_v63  ;;  %v4294_v35 = vor.u32 %v5221_v6, %v4293_v4  ;;  %v5170_v48 = vld [vmem:[#allocation4 + $0x40] sm:$0xf0] }
  0xf6   :  { %1943 = vmatpush.bf16.msra.mxu0 %v4302_v57  ;;  %1983 = vmatpush.bf16.msrb.mxu2 %v4294_v35 }
  0xf7   :  { %1908 = vmatpush.bf16.msra.mxu1 %v4250_v3 }
  0xf9   :  { %v1236_v16 = vpop.f32.mrf.mxu0 }
  0xfa   :  { %v1260_v30 = vpop.f32.mrf.mxu3  ;;  %v1249_v15 = vpop.f32.mrf.mxu1  ;;  %1944 = vmatpush.bf16.msra.mxu0 %v4290_v7  ;;  %v4282_v16 = vor.u32 %v5218_v14, %v4281_v53  ;;  %v4417_v53 = vld [vmem:[#allocation6 + $0x90] sm:$0xf]  ;;  %v5253_v14 = vld [vmem:[#allocation6 + $0x98] sm:$0xf0] }
  0xfb   :  { %v1261_v31 = vadd.f32 %v1260_v30, %v1248_v21  ;;  %1953 = vmatpush.bf16.msrb.mxu1 %v4150_v8  ;;  %v4278_v30 = vor.u32 %v5216_v10, %v4275_v5  ;;  %v4138_v15 = vor.u32 %v5182_v12, %v4137_v11  ;;  %v4429_v11 = vld [vmem:[#allocation6 + $0xa8] sm:$0xf] }
  0xfc   :  { %1984 = vmatpush.bf16.msrb.mxu2 %v4282_v16 }
  0xfd   :  { %v1273_v27 = vpop.f32.mrf.mxu2 }
  0xfe   :  { %v1274_v44 = vadd.f32 %v1273_v27, %v1261_v31  ;;  %1945 = vmatpush.bf16.msra.mxu0 %v4278_v30  ;;  %v4270_v27 = vor.u32 %v5215_v24, %v4269_v19  ;;  %v4251_v31 = vld [vmem:[#allocation4 + $0x18c] sm:$0xf0]  ;;  %v5256_v30 = vld [vmem:[#allocation6 + $0xb0] sm:$0xf0] }
  0xff   :  { %1954 = vmatpush.bf16.msrb.mxu1 %v4138_v15  ;;  %v4254_v33 = vor.u32 %v5210_v29, %v4251_v31  ;;  %v4430_v12 = vor.u32 %v5256_v30, %v4429_v11  ;;  %v4418_v15 = vor.u32 %v5253_v14, %v4417_v53  ;;  %v5280_v31 = vld [vmem:[#allocation6 + $0x170] sm:$0xf0] }
 0x100   :  { %1985 = vmatpush.bf16.msrb.mxu2 %v4270_v27  ;;  %v5244_v27 = vld [vmem:[#allocation6 + $0x50] sm:$0xf0] }
 0x101   :  { %v5268_v11 = vld [vmem:[#allocation6 + $0x110] sm:$0xf0] }
 0x102   :  { %v1262_v46 = vpop.f32.mrf.mxu3  ;;  %v1286_v50 = vpop.f32.mrf.mxu1  ;;  %1946 = vmatpush.bf16.msra.mxu0 %v4266_v22  ;;  %v5247_v22 = vld [vmem:[#allocation6 + $0x68] sm:$0xf0]  ;;  %v5240_v30 = vld [vmem:[#allocation6 + $0x34] sm:$0xf] }
 0x103   :  { %v1287_v52 = vadd.f32 %v1286_v50, %v1274_v44  ;;  %1955 = vmatpush.bf16.msrb.mxu1 %v4126_v25  ;;  %v5173_v44 = vld [vmem:[#allocation4 + $0x58] sm:$0xf0]  ;;  %v4090_v50 = vor.u32 %v5170_v48, %v4089_v47  ;;  %v4381_v25 = vld [vmem:[#allocation6 + $0x48] sm:$0xf]  ;;  %v4357_v47 = vld [vmem:[#allocation6 + $0x18] sm:$0xf] }
 0x104   :  { %1986 = vmatpush.bf16.msrb.mxu2 %v4258_v39  ;;  %v4102_v46 = vor.u32 %v5173_v44, %v4101_v43  ;;  %v4382_v29 = vor.u32 %v5244_v27, %v4381_v25  ;;  %v4513_v39 = vld [vmem:[#allocation6 + $0x150] sm:$0xf]  ;;  %v4407_v43 = vld [vmem:[#allocation6 + $0x84] sm:$0xf0]  ;;  %v5238_v48 = vld [vmem:[#allocation6 + $0x20] sm:$0xf0] }
 0x105   :  { %v1275_v56 = vpop.f32.mrf.mxu2  ;;  %v1382_v62 = vmax.f32 %v1287_v52, 0.0  ;;  %v4077_v52 = vld [vmem:[#allocation4 + $0x20] sm:$0xf]  ;;  %v5276_v14 = vld [vmem:[#allocation6 + $0x154] sm:$0xf] }
 0x106   :  { %1947 = vmatpush.bf16.msra.mxu0 %v4254_v33  ;;  %v4078_v55 = vor.u32 %v5167_v45, %v4077_v52  ;;  %v4419_v33 = vld [vmem:[#allocation6 + $0x9c] sm:$0xf0]  ;;  %v4395_v52 = vld [vmem:[#allocation6 + $0x6c] sm:$0xf0]  ;;  %v4358_v45 = vor.u32 %v5238_v48, %v4357_v47  ;;  %v4503_v27 = vld [vmem:[#allocation6 + $0x144] sm:$0xf0] }
 0x107   :  { %v1385_v2 = vpack.c.bf16 %v1382_v62, %v1382_v62  ;;  %1956 = vmatpush.bf16.msrb.mxu1 %v4114_v38  ;;  %v4422_v36 = vor.u32 %v5252_v32, %v4419_v33  ;;  %v5241_v38 = vld [vmem:[#allocation6 + $0x38] sm:$0xf0]  ;;  %v4453_v33 = vld [vmem:[#allocation6 + $0xd8] sm:$0xf]  ;;  %v5292_v47 = vld [vmem:[#allocation6 + $0x1d0] sm:$0xf0] }
 0x109   :  { %1896 = vmatmul.bf16.vlgmr.msrb.gmra.mxu0 %v1385_v2  ;;  %1935 = vmatmul.bf16.vlgmr.msra.gmra.mxu2 %v1385_v2 }
 0x10a   :  { %1974 = vmatmul.bf16.vlgmr.msra.gmra.mxu3 %v1385_v2  ;;  %v1288_v9 = vpop.f32.mrf.mxu1  ;;  %2486 = vmatpush.bf16.msrb.mxu0 %v4430_v12  ;;  %v4371_v12 = vld [vmem:[#allocation6 + $0x3c] sm:$0xf0] }
 0x10b   :  { %1957 = vmatpush.bf16.msrb.mxu1 %v4102_v46  ;;  %v4374_v18 = vor.u32 %v5240_v30, %v4371_v12  ;;  %v5275_v12 = vld [vmem:[#allocation6 + $0x148] sm:$0xf0] }
 0x10e   :  { %2487 = vmatpush.bf16.msrb.mxu0 %v4418_v15  ;;  %v4515_v15 = vld [vmem:[#allocation6 + $0x15c] sm:$0xf0] }
 0x10f   :  { %1958 = vmatpush.bf16.msrb.mxu1 %v4090_v50  ;;  %v5274_v50 = vld [vmem:[#allocation6 + $0x140] sm:$0xf0] }
 0x111   :  { %v1325_v17 = vpop.f32.mrf.mxu0 }
 0x112   :  { %2488 = vmatpush.bf16.msrb.mxu0 %v4406_v20  ;;  %v4465_v20 = vld [vmem:[#allocation6 + $0xf0] sm:$0xf] }
 0x113   :  { %1959 = vmatpush.bf16.msrb.mxu1 %v4078_v55  ;;  %v5235_v55 = vld [vmem:[#allocation6 + $0x8] sm:$0xf0] }
 0x116   :  { %v1299_v21 = vpop.f32.mrf.mxu1 }
 0x117   :  { %v1300_v56 = vadd.f32 %v1299_v21, %v316_v51  ;;  %1960 = vmatpush.bf16.msrb.mxu1 %v4066_v61  ;;  %v4393_v21 = vld [vmem:[#allocation6 + $0x60] sm:$0xf]  ;;  %v5246_v51 = vld [vmem:[#allocation6 + $0x64] sm:$0xf]  ;;  %v5243_v61 = vld [vmem:[#allocation6 + $0x4c] sm:$0xf] }
 0x118   :  { %v4394_v19 = vor.u32 %v5247_v22, %v4393_v21  ;;  %v5265_v21 = vld [vmem:[#allocation6 + $0xf8] sm:$0xf0] }
 0x119   :  { %v1327_v40 = vpop.f32.mrf.mxu0 }
 0x11a   :  { %v1312_v28 = vpop.f32.mrf.mxu3  ;;  %2489 = vmatpush.bf16.msrb.mxu0 %v4394_v19  ;;  %v4370_v40 = vor.u32 %v5241_v38, %v4369_v37  ;;  %v4359_v19 = vld [vmem:[#allocation6 + $0x24] sm:$0xf0]  ;;  %v5234_v37 = vld [vmem:[#allocation6 + $0x4] sm:$0xf]  ;;  %v4347_v38 = vld [vmem:[#allocation6 + $0xc] sm:$0xf0] }
 0x11b   :  { %v1313_v62 = vadd.f32 %v1312_v28, %v1300_v56  ;;  %v4525_v28 = vld [vmem:[#allocation6 + $0x168] sm:$0xf] }
 0x11c   :  { %v4526_v34 = vor.u32 %v5280_v31, %v4525_v28  ;;  %v4585_v28 = vld [vmem:[#allocation6 + $0x1e0] sm:$0xf]  ;;  %v4466_v31 = vor.u32 %v5265_v21, %v4465_v20  ;;  %v4599_v20 = vld [vmem:[#allocation6 + $0x204] sm:$0xf0] }
 0x11d   :  { %v1338_v42 = vpop.f32.mrf.mxu2  ;;  %v1326_v0 = vadd.f32 %v1325_v17, %v1313_v62  ;;  %v4383_v62 = vld [vmem:[#allocation6 + $0x54] sm:$0xf0] }
 0x11e   :  { %v1301_v41 = vpop.f32.mrf.mxu1  ;;  %2490 = vmatpush.bf16.msrb.mxu0 %v4382_v29  ;;  %v5295_v29 = vld [vmem:[#allocation6 + $0x1e8] sm:$0xf0] }
 0x11f   :  { %v1339_v1 = vadd.f32 %v1338_v42, %v1326_v0  ;;  %v5277_v41 = vld [vmem:[#allocation6 + $0x158] sm:$0xf0]  ;;  %v5304_v0 = vld [vmem:[#allocation6 + $0x230] sm:$0xf0] }
 0x120   :  { %v5249_v42 = vld [vmem:[#allocation6 + $0x7c] sm:$0xf]  ;;  %v4514_v44 = vor.u32 %v5277_v41, %v4513_v39  ;;  %v5270_v39 = vld [vmem:[#allocation6 + $0x124] sm:$0xf]  ;;  %v4491_v41 = vld [vmem:[#allocation6 + $0x12c] sm:$0xf0] }
 0x121   :  { %v1377_v54 = vpop.f32.mrf.mxu0  ;;  %v4410_v46 = vor.u32 %v5249_v42, %v4407_v43  ;;  %v4533_v42 = vld [vmem:[#allocation6 + $0x170] sm:$0xf]  ;;  %v5281_v43 = vld [vmem:[#allocation6 + $0x178] sm:$0xf0] }
 0x122   :  { %v1314_v49 = vpop.f32.mrf.mxu3  ;;  %2491 = vmatpush.bf16.msrb.mxu0 %v4370_v40  ;;  %v4586_v40 = vor.u32 %v5295_v29, %v4585_v28  ;;  %v5258_v28 = vld [vmem:[#allocation6 + $0xc4] sm:$0xf] }
 0x123   :  { %v4501_v49 = vld [vmem:[#allocation6 + $0x138] sm:$0xf] }
 0x124   :  { %v4502_v56 = vor.u32 %v5274_v50, %v4501_v49  ;;  %v4350_v50 = vor.u32 %v5234_v37, %v4347_v38  ;;  %v4485_v37 = vld [vmem:[#allocation6 + $0x110] sm:$0xf]  ;;  %v5269_v38 = vld [vmem:[#allocation6 + $0x118] sm:$0xf0] }
 0x125   :  { %v1340_v57 = vpop.f32.mrf.mxu2 }
 0x126   :  { %v4398_v57 = vor.u32 %v5246_v51, %v4395_v52  ;;  %2492 = vmatpush.bf16.msrb.mxu0 %v4358_v45  ;;  %v4494_v52 = vor.u32 %v5270_v39, %v4491_v41  ;;  %v4534_v45 = vor.u32 %v5281_v43, %v4533_v42  ;;  %v4486_v39 = vor.u32 %v5269_v38, %v4485_v37  ;;  %v5283_v41 = vld [vmem:[#allocation6 + $0x188] sm:$0xf0]  ;;  %v5305_v37 = vld [vmem:[#allocation6 + $0x238] sm:$0xf0] }
 0x127   :  { %v5291_v43 = vld [vmem:[#allocation6 + $0x1cc] sm:$0xf] }
 0x129   :  { %v1379_v63 = vpop.f32.mrf.mxu0 }
 0x12a   :  { %v4621_v63 = vld [vmem:[#allocation6 + $0x228] sm:$0xf] }
 0x136   :  { %v1351_v2 = vpop.f32.mrf.mxu1 }
 0x137   :  { %v1352_v3 = vadd.f32 %v1351_v2, %v1339_v1  ;;  %v5279_v1 = vld [vmem:[#allocation6 + $0x16c] sm:$0xf]  ;;  %v4527_v2 = vld [vmem:[#allocation6 + $0x174] sm:$0xf0] }
 0x13a   :  { %v1364_v4 = vpop.f32.mrf.mxu3 }
 0x13b   :  { %v1365_v13 = vadd.f32 %v1364_v4, %v1352_v3  ;;  %v4622_v3 = vor.u32 %v5304_v0, %v4621_v63  ;;  %v5278_v63 = vld [vmem:[#allocation6 + $0x160] sm:$0xf0] }
 0x13d   :  { %v1378_v6 = vadd.f32 %v1377_v54, %v1365_v13  ;;  %v4345_v54 = vld [vmem:[#allocation6] sm:$0xf]  ;;  %v4490_v13 = vor.u32 %v5271_v59, %v4489_v58  ;;  %2512 = vmatpush.bf16.msrb.mxu3 %v4622_v3  ;;  %v5303_v58 = vld [vmem:[#allocation6 + $0x22c] sm:$0xf]  ;;  %v4623_v59 = vld [vmem:[#allocation6 + $0x234] sm:$0xf0] }
 0x13e   :  { %v1353_v8 = vpop.f32.mrf.mxu1  ;;  %v4346_v4 = vor.u32 %v5235_v55, %v4345_v54  ;;  %v4441_v54 = vld [vmem:[#allocation6 + $0xc0] sm:$0xf]  ;;  %v5259_v55 = vld [vmem:[#allocation6 + $0xc8] sm:$0xf0] }
 0x13f   :  { %v1383_v7 = vmax.f32 %v1378_v6, 0.0  ;;  %v4386_v6 = vor.u32 %v5243_v61, %v4383_v62  ;;  %v4609_v8 = vld [vmem:[#allocation6 + $0x210] sm:$0xf]  ;;  %v4521_v62 = vld [vmem:[#allocation6 + $0x158] sm:$0xf]  ;;  %v4442_v0 = vor.u32 %v5259_v55, %v4441_v54 }
 0x140   :  { %2493 = vmatpush.bf16.msrb.mxu0 %v4346_v4  ;;  %v4522_v3 = vor.u32 %v5278_v63, %v4521_v62  ;;  %v5264_v4 = vld [vmem:[#allocation6 + $0xf4] sm:$0xf]  ;;  %v5263_v63 = vld [vmem:[#allocation6 + $0xe8] sm:$0xf0] }
 0x141   :  { %v1386_v9 = vpack.c.bf16 %v1383_v7, %v1383_v7  ;;  %v4477_v7 = vld [vmem:[#allocation6 + $0x108] sm:$0xf]  ;;  %v5288_v55 = vld [vmem:[#allocation6 + $0x1b4] sm:$0xf] }
 0x142   :  { %v1366_v35 = vpop.f32.mrf.mxu3  ;;  %v4478_v60 = vor.u32 %v5268_v11, %v4477_v7  ;;  %v4509_v11 = vld [vmem:[#allocation6 + $0x140] sm:$0xf] }
 0x143   :  { %1909 = vmatmul.bf16.vlgmr.msra.gmra.mxu1 %v1386_v9  ;;  %1948 = vmatmul.bf16.vlgmr.msra.gmra.mxu0 %v1386_v9  ;;  %v4530_v35 = vor.u32 %v5279_v1, %v4527_v2  ;;  %v4626_v2 = vor.u32 %v5303_v58, %v4623_v59  ;;  %v5254_v59 = vld [vmem:[#allocation6 + $0xa0] sm:$0xf0] }
 0x144   :  { %1987 = vmatmul.bf16.vlgmr.msrb.gmra.mxu2 %v1386_v9  ;;  %2499 = vmatpush.bf16.msra.mxu1 %v4526_v34  ;;  %v5301_v9 = vld [vmem:[#allocation6 + $0x218] sm:$0xf0]  ;;  %v5262_v34 = vld [vmem:[#allocation6 + $0xe0] sm:$0xf0] }
 0x145   :  { %v4610_v53 = vor.u32 %v5301_v9, %v4609_v8  ;;  %2538 = vmatpush.bf16.msra.mxu0 %v4530_v35  ;;  %v4454_v49 = vor.u32 %v5262_v34, %v4453_v33  ;;  %v5300_v9 = vld [vmem:[#allocation6 + $0x214] sm:$0xf]  ;;  %v4611_v35 = vld [vmem:[#allocation6 + $0x21c] sm:$0xf0]  ;;  %v4587_v33 = vld [vmem:[#allocation6 + $0x1ec] sm:$0xf0] }
 0x146   :  { %v4614_v30 = vor.u32 %v5300_v9, %v4611_v35  ;;  %v5674_v35 = vld [vmem:[%s5788_s4] sm:$0x7] }
 0x147   :  { %2513 = vmatpush.bf16.msrb.mxu3 %v4610_v53  ;;  %v4510_v53 = vor.u32 %v5275_v12, %v4509_v11  ;;  %v5282_v11 = vld [vmem:[#allocation6 + $0x184] sm:$0xf]  ;;  %v4401_v12 = vld [vmem:[#allocation6 + $0x68] sm:$0xf] }
 0x148   :  { %2500 = vmatpush.bf16.msra.mxu1 %v4514_v44 }
 0x14c   :  { %2501 = vmatpush.bf16.msra.mxu1 %v4502_v56  ;;  %v5267_v56 = vld [vmem:[#allocation6 + $0x10c] sm:$0xf] }
 0x150   :  { %2502 = vmatpush.bf16.msra.mxu1 %v4490_v13  ;;  %v4467_v13 = vld [vmem:[#allocation6 + $0xfc] sm:$0xf0] }
 0x151   :  { %v4470_v8 = vor.u32 %v5264_v4, %v4467_v13  ;;  %v5251_v13 = vld [vmem:[#allocation6 + $0x88] sm:$0xf0] }
 0x153   :  { %1961 = vmatmul.bf16.vlgmr.msrb.gmra.mxu1 %v5654_v26  ;;  %v5255_v26 = vld [vmem:[#allocation6 + $0xac] sm:$0xf] }
 0x154   :  { %v4434_v24 = vor.u32 %v5255_v26, %v4431_v23  ;;  %v4518_v26 = vor.u32 %v5276_v14, %v4515_v15  ;;  %v5237_v23 = vld [vmem:[#allocation6 + $0x1c] sm:$0xf]  ;;  %2503 = vmatpush.bf16.msra.mxu1 %v4478_v60  ;;  %v4561_v14 = vld [vmem:[#allocation6 + $0x1b0] sm:$0xf]  ;;  %v4455_v60 = vld [vmem:[#allocation6 + $0xe4] sm:$0xf0] }
 0x155   :  { %v4362_v32 = vor.u32 %v5237_v23, %v4359_v19  ;;  %v5289_v15 = vld [vmem:[#allocation6 + $0x1b8] sm:$0xf0]  ;;  %v4497_v23 = vld [vmem:[#allocation6 + $0x128] sm:$0xf]  ;;  %v5272_v19 = vld [vmem:[#allocation6 + $0x130] sm:$0xf0] }
 0x156   :  { %2525 = vmatpush.bf16.msra.mxu2 %v4434_v24  ;;  %v5273_v24 = vld [vmem:[#allocation6 + $0x13c] sm:$0xf]  ;;  %2539 = vmatpush.bf16.msra.mxu0 %v4518_v26 }
 0x158   :  { %2504 = vmatpush.bf16.msra.mxu1 %v4466_v31  ;;  %v4443_v31 = vld [vmem:[#allocation6 + $0xcc] sm:$0xf0] }
 0x159   :  { %v4446_v34 = vor.u32 %v5258_v28, %v4443_v31  ;;  %v4365_v31 = vld [vmem:[#allocation6 + $0x20] sm:$0xf] }
 0x15a   :  { %2526 = vmatpush.bf16.msra.mxu2 %v4422_v36  ;;  %v4506_v36 = vor.u32 %v5273_v24, %v4503_v27  ;;  %v4498_v24 = vor.u32 %v5272_v19, %v4497_v23  ;;  %v5286_v27 = vld [vmem:[#allocation6 + $0x1a0] sm:$0xf0] }
 0x15c   :  { %2540 = vmatpush.bf16.msra.mxu0 %v4506_v36  ;;  %2505 = vmatpush.bf16.msra.mxu1 %v4454_v49 }
 0x15e   :  { %2527 = vmatpush.bf16.msra.mxu2 %v4410_v46  ;;  %v4573_v46 = vld [vmem:[#allocation6 + $0x1c8] sm:$0xf] }
 0x15f   :  { %v5661_v10 = vpop.f32.mrf.mxu2  ;;  %v4574_v61 = vor.u32 %v5292_v47, %v4573_v46  ;;  %v4575_v46 = vld [vmem:[#allocation6 + $0x1d4] sm:$0xf0]  ;;  %v4437_v47 = vld [vmem:[#allocation6 + $0xb0] sm:$0xf] }
 0x160   :  { %v5663_v5 = vpop.f32.mrf.mxu3  ;;  %2541 = vmatpush.bf16.msra.mxu0 %v4494_v52  ;;  %2506 = vmatpush.bf16.msra.mxu1 %v4442_v0  ;;  %v4578_v49 = vor.u32 %v5291_v43, %v4575_v46  ;;  %v5266_v52 = vld [vmem:[#allocation6 + $0x100] sm:$0xf0]  ;;  %v5236_v43 = vld [vmem:[#allocation6 + $0x10] sm:$0xf0] }
 0x162   :  { %2528 = vmatpush.bf16.msra.mxu2 %v4398_v57  ;;  %v4479_v57 = vld [vmem:[#allocation6 + $0x114] sm:$0xf0] }
 0x163   :  { %v4482_v1 = vor.u32 %v5267_v56, %v4479_v57  ;;  %v4563_v56 = vld [vmem:[#allocation6 + $0x1bc] sm:$0xf0]  ;;  %v4425_v57 = vld [vmem:[#allocation6 + $0x98] sm:$0xf] }
 0x164   :  { %2551 = vmatpush.bf16.msrb.mxu1 %v4626_v2  ;;  %v4566_v58 = vor.u32 %v5288_v55, %v4563_v56  ;;  %v4426_v62 = vor.u32 %v5254_v59, %v4425_v57  ;;  %v4551_v2 = vld [vmem:[#allocation6 + $0x1a4] sm:$0xf0]  ;;  %v5328_v55 = vld [vmem:[#allocation7 + $0xb0] sm:$0xf0]  ;;  %v4705_v56 = vld [vmem:[#allocation7 + $0x90] sm:$0xf] }
 0x165   :  { %2542 = vmatpush.bf16.msra.mxu0 %v4482_v1  ;;  %v5285_v1 = vld [vmem:[#allocation6 + $0x19c] sm:$0xf] }
 0x166   :  { %2529 = vmatpush.bf16.msra.mxu2 %v4386_v6  ;;  %v4554_v4 = vor.u32 %v5285_v1, %v4551_v2  ;;  %v5325_v59 = vld [vmem:[#allocation7 + $0x98] sm:$0xf0]  ;;  %v4693_v2 = vld [vmem:[#allocation7 + $0x78] sm:$0xf] }
 0x167   :  { %v1886_v16 = vpop.f32.mrf.mxu2 }
 0x168   :  { %v1925_v17 = vpop.f32.mrf.mxu3  ;;  %v4597_v16 = vld [vmem:[#allocation6 + $0x1f8] sm:$0xf]  ;;  %2552 = vmatpush.bf16.msrb.mxu1 %v4614_v30  ;;  %v4539_v30 = vld [vmem:[#allocation6 + $0x18c] sm:$0xf0] }
 0x169   :  { %v5298_v17 = vld [vmem:[#allocation6 + $0x200] sm:$0xf0]  ;;  %2543 = vmatpush.bf16.msra.mxu0 %v4470_v8 }
 0x16a   :  { %v4598_v25 = vor.u32 %v5298_v17, %v4597_v16  ;;  %2530 = vmatpush.bf16.msra.mxu2 %v4374_v18  ;;  %v5261_v16 = vld [vmem:[#allocation6 + $0xdc] sm:$0xf]  ;;  %v4562_v17 = vor.u32 %v5289_v15, %v4561_v14  ;;  %v5248_v14 = vld [vmem:[#allocation6 + $0x70] sm:$0xf0] }
 0x16b   :  { %v5297_v18 = vld [vmem:[#allocation6 + $0x1fc] sm:$0xf]  ;;  %v4458_v21 = vor.u32 %v5261_v16, %v4455_v60  ;;  %v4402_v15 = vor.u32 %v5248_v14, %v4401_v12  ;;  %v1485_v16 = vperm.slane %v5674_v35, 0  ;;  %v4389_v60 = vld [vmem:[#allocation6 + $0x50] sm:$0xf] }
 0x16c   :  { %2514 = vmatpush.bf16.msrb.mxu3 %v4598_v25  ;;  %v4602_v26 = vor.u32 %v5297_v18, %v4599_v20  ;;  %v4549_v25 = vld [vmem:[#allocation6 + $0x198] sm:$0xf]  ;;  %v5245_v18 = vld [vmem:[#allocation6 + $0x58] sm:$0xf0]  ;;  %v5319_v12 = vld [vmem:[#allocation7 + $0x68] sm:$0xf0] }
 0x16d   :  { %2544 = vmatpush.bf16.msra.mxu0 %v4458_v21  ;;  %v4550_v29 = vor.u32 %v5286_v27, %v4549_v25  ;;  %v4390_v20 = vor.u32 %v5245_v18, %v4389_v60  ;;  %v4377_v21 = vld [vmem:[#allocation6 + $0x38] sm:$0xf]  ;;  %v1885_v23 = vadd.f32 %v5661_v10, %v1485_v16  ;;  %v4813_v16 = vld [vmem:[#allocation7 + $0x168] sm:$0xf] }
 0x16e   :  { %2531 = vmatpush.bf16.msra.mxu2 %v4362_v32  ;;  %2553 = vmatpush.bf16.msrb.mxu1 %v4602_v26  ;;  %v5294_v32 = vld [vmem:[#allocation6 + $0x1e4] sm:$0xf] }
 0x16f   :  { %v4590_v36 = vor.u32 %v5294_v32, %v4587_v33  ;;  %v5242_v26 = vld [vmem:[#allocation6 + $0x40] sm:$0xf0]  ;;  %v5239_v32 = vld [vmem:[#allocation6 + $0x28] sm:$0xf0] }
 0x170   :  { %2515 = vmatpush.bf16.msrb.mxu3 %v4586_v40  ;;  %v4537_v40 = vld [vmem:[#allocation6 + $0x180] sm:$0xf]  ;;  %v4366_v38 = vor.u32 %v5239_v32, %v4365_v31  ;;  %v4657_v31 = vld [vmem:[#allocation7 + $0x30] sm:$0xf]  ;;  %v5313_v32 = vld [vmem:[#allocation7 + $0x38] sm:$0xf0] }
 0x171   :  { %2545 = vmatpush.bf16.msra.mxu0 %v4446_v34  ;;  %v4538_v42 = vor.u32 %v5283_v41, %v4537_v40 }
 0x172   :  { %2532 = vmatpush.bf16.msra.mxu2 %v4350_v50  ;;  %2554 = vmatpush.bf16.msrb.mxu1 %v4590_v36  ;;  %v5257_v50 = vld [vmem:[#allocation6 + $0xb8] sm:$0xf0]  ;;  %v4629_v36 = vld [vmem:[#allocation6 + $0x230] sm:$0xf] }
 0x173   :  { %v4630_v40 = vor.u32 %v5305_v37, %v4629_v36  ;;  %v4545_v36 = vld [vmem:[#allocation6 + $0x188] sm:$0xf]  ;;  %v5284_v37 = vld [vmem:[#allocation6 + $0x190] sm:$0xf0] }
 0x174   :  { %2516 = vmatpush.bf16.msrb.mxu3 %v4574_v61  ;;  %v4461_v61 = vld [vmem:[#allocation6 + $0xe0] sm:$0xf] }
 0x175   :  { %v4462_v0 = vor.u32 %v5263_v63, %v4461_v61  ;;  %v1487_v61 = vperm.slane %v5674_v35, 2  ;;  %v5296_v63 = vld [vmem:[#allocation6 + $0x1f0] sm:$0xf0] }
 0x176   :  { %2577 = vmatpush.bf16.msrb.mxu2 %v4534_v45  ;;  %v4438_v45 = vor.u32 %v5257_v50, %v4437_v47  ;;  %2555 = vmatpush.bf16.msrb.mxu1 %v4578_v49 }
 0x178   :  { %2517 = vmatpush.bf16.msrb.mxu3 %v4562_v17  ;;  %v1486_v17 = vperm.slane %v5674_v35, 1 }
 0x17a   :  { %2578 = vmatpush.bf16.msrb.mxu2 %v4522_v3  ;;  %2556 = vmatpush.bf16.msrb.mxu1 %v4566_v58  ;;  %v4413_v3 = vld [vmem:[#allocation6 + $0x80] sm:$0xf]  ;;  %v1924_v19 = vadd.f32 %v5663_v5, %v1486_v17  ;;  %v5352_v17 = vld [vmem:[#allocation7 + $0x170] sm:$0xf0] }
 0x17b   :  { %v4414_v8 = vor.u32 %v5251_v13, %v4413_v3  ;;  %v5322_v3 = vld [vmem:[#allocation7 + $0x80] sm:$0xf0] }
 0x17c   :  { %2518 = vmatpush.bf16.msrb.mxu3 %v4550_v29 }
 0x17e   :  { %2579 = vmatpush.bf16.msrb.mxu2 %v4510_v53  ;;  %2557 = vmatpush.bf16.msrb.mxu1 %v4554_v4  ;;  %v4542_v53 = vor.u32 %v5282_v11, %v4539_v30  ;;  %v4681_v30 = vld [vmem:[#allocation7 + $0x60] sm:$0xf] }
 0x17f   :  { %v4682_v60 = vor.u32 %v5319_v12, %v4681_v30  ;;  %v5312_v30 = vld [vmem:[#allocation7 + $0x34] sm:$0xf]  ;;  %v4659_v12 = vld [vmem:[#allocation7 + $0x3c] sm:$0xf0] }
 0x180   :  { %2519 = vmatpush.bf16.msrb.mxu3 %v4538_v42  ;;  %v4617_v42 = vld [vmem:[#allocation6 + $0x218] sm:$0xf] }
 0x182   :  { %2580 = vmatpush.bf16.msrb.mxu2 %v4498_v24  ;;  %2558 = vmatpush.bf16.msrb.mxu1 %v4542_v53  ;;  %v4378_v24 = vor.u32 %v5242_v26, %v4377_v21  ;;  %v4569_v53 = vld [vmem:[#allocation6 + $0x1b8] sm:$0xf]  ;;  %v5316_v21 = vld [vmem:[#allocation7 + $0x50] sm:$0xf0] }
 0x184   :  { %2564 = vmatpush.bf16.msra.mxu3 %v4438_v45  ;;  %v5299_v45 = vld [vmem:[#allocation6 + $0x208] sm:$0xf0] }
 0x186   :  { %v5665_v22 = vpop.f32.mrf.mxu0  ;;  %2581 = vmatpush.bf16.msrb.mxu2 %v4486_v39 }
 0x187   :  { %v1898_v25 = vadd.f32 %v5665_v22, %v1885_v23  ;;  %v5302_v22 = vld [vmem:[#allocation6 + $0x220] sm:$0xf0] }
 0x188   :  { %2565 = vmatpush.bf16.msra.mxu3 %v4426_v62  ;;  %v4593_v62 = vld [vmem:[#allocation6 + $0x1e8] sm:$0xf] }
 0x189   :  { %v4594_v13 = vor.u32 %v5296_v63, %v4593_v62  ;;  %v4777_v62 = vld [vmem:[#allocation7 + $0x120] sm:$0xf]  ;;  %v5343_v63 = vld [vmem:[#allocation7 + $0x128] sm:$0xf0] }
 0x18c   :  { %v5667_v44 = vpop.f32.mrf.mxu2  ;;  %2566 = vmatpush.bf16.msra.mxu3 %v4414_v8  ;;  %v5293_v8 = vld [vmem:[#allocation6 + $0x1d8] sm:$0xf0] }
 0x18d   :  { %v5669_v48 = vpop.f32.mrf.mxu3  ;;  %v1937_v27 = vadd.f32 %v5667_v44, %v1924_v19  ;;  %v4353_v44 = vld [vmem:[#allocation6 + $0x8] sm:$0xf]  ;;  %v4814_v19 = vor.u32 %v5352_v17, %v4813_v16  ;;  %v4753_v16 = vld [vmem:[#allocation7 + $0xf0] sm:$0xf] }
 0x18e   :  { %v1899_v51 = vpop.f32.mrf.mxu0  ;;  %v4354_v47 = vor.u32 %v5236_v43, %v4353_v44  ;;  %v5321_v43 = vld [vmem:[#allocation7 + $0x7c] sm:$0xf] }
 0x18f   :  { %v4473_v51 = vld [vmem:[#allocation6 + $0xf8] sm:$0xf] }
 0x190   :  { %v4474_v54 = vor.u32 %v5266_v52, %v4473_v51  ;;  %2567 = vmatpush.bf16.msra.mxu3 %v4402_v15  ;;  %v4618_v51 = vor.u32 %v5302_v22, %v4617_v42  ;;  %v4605_v52 = vld [vmem:[#allocation6 + $0x200] sm:$0xf]  ;;  %v5290_v15 = vld [vmem:[#allocation6 + $0x1c0] sm:$0xf0]  ;;  %v5324_v42 = vld [vmem:[#allocation7 + $0x94] sm:$0xf] }
 0x191   :  { %v4606_v57 = vor.u32 %v5299_v45, %v4605_v52  ;;  %v4570_v23 = vor.u32 %v5290_v15, %v4569_v53  ;;  %v4707_v22 = vld [vmem:[#allocation7 + $0x9c] sm:$0xf0]  ;;  %v4789_v52 = vld [vmem:[#allocation7 + $0x138] sm:$0xf]  ;;  %v5346_v45 = vld [vmem:[#allocation7 + $0x140] sm:$0xf0]  ;;  %v4662_v53 = vor.u32 %v5312_v30, %v4659_v12 }
 0x192   :  { %2582 = vmatpush.bf16.msrb.mxu2 %v4474_v54  ;;  %v4717_v54 = vld [vmem:[#allocation7 + $0xa8] sm:$0xf]  ;;  %v4710_v44 = vor.u32 %v5324_v42, %v4707_v22  ;;  %v4803_v15 = vld [vmem:[#allocation7 + $0x15c] sm:$0xf0]  ;;  %v5353_v42 = vld [vmem:[#allocation7 + $0x178] sm:$0xf0] }
 0x193   :  { %v4718_v58 = vor.u32 %v5328_v55, %v4717_v54  ;;  %v5318_v54 = vld [vmem:[#allocation7 + $0x64] sm:$0xf]  ;;  %v4790_v55 = vor.u32 %v5346_v45, %v4789_v52  ;;  %v4743_v12 = vld [vmem:[#allocation7 + $0xe4] sm:$0xf0] }
 0x194   :  { %v1938_v6 = vpop.f32.mrf.mxu2  ;;  %2568 = vmatpush.bf16.msra.mxu3 %v4390_v20  ;;  %v4669_v20 = vld [vmem:[#allocation7 + $0x48] sm:$0xf] }
 0x195   :  { %v1977_v7 = vpop.f32.mrf.mxu3  ;;  %v4449_v6 = vld [vmem:[#allocation6 + $0xc8] sm:$0xf] }
 0x196   :  { %2583 = vmatpush.bf16.msrb.mxu2 %v4462_v0  ;;  %v5260_v7 = vld [vmem:[#allocation6 + $0xd0] sm:$0xf0]  ;;  %v4706_v0 = vor.u32 %v5325_v59, %v4705_v56  ;;  %v4683_v56 = vld [vmem:[#allocation7 + $0x6c] sm:$0xf0]  ;;  %v5307_v59 = vld [vmem:[#allocation7 + $0x8] sm:$0xf0] }
 0x197   :  { %v4450_v9 = vor.u32 %v5260_v7, %v4449_v6  ;;  %v4581_v7 = vld [vmem:[#allocation6 + $0x1d0] sm:$0xf] }
 0x198   :  { %2569 = vmatpush.bf16.msra.mxu3 %v4378_v24  ;;  %v4582_v35 = vor.u32 %v5293_v8, %v4581_v7  ;;  %v5340_v7 = vld [vmem:[#allocation7 + $0x110] sm:$0xf0]  ;;  %v4909_v8 = vld [vmem:[#allocation7 + $0x228] sm:$0xf] }
 0x19a   :  { %2584 = vmatpush.bf16.msrb.mxu2 %v4450_v9  ;;  %v4694_v9 = vor.u32 %v5322_v3, %v4693_v2  ;;  %v5351_v2 = vld [vmem:[#allocation7 + $0x16c] sm:$0xf]  ;;  %v4815_v3 = vld [vmem:[#allocation7 + $0x174] sm:$0xf0] }
 0x19c   :  { %2570 = vmatpush.bf16.msra.mxu3 %v4366_v38  ;;  %v5327_v38 = vld [vmem:[#allocation7 + $0xac] sm:$0xf] }
 0x1a0   :  { %2571 = vmatpush.bf16.msra.mxu3 %v4354_v47 }
 0x1c0   :  { %v1910_v28 = vpop.f32.mrf.mxu1  ;;  %v1949_v29 = vpop.f32.mrf.mxu0 }
 0x1c1   :  { %v1911_v33 = vadd.f32 %v1910_v28, %v1898_v25  ;;  %v1950_v34 = vadd.f32 %v1949_v29, %v1937_v27  ;;  %v5287_v25 = vld [vmem:[#allocation6 + $0x1a8] sm:$0xf0]  ;;  %v4801_v27 = vld [vmem:[#allocation7 + $0x150] sm:$0xf]  ;;  %v5349_v28 = vld [vmem:[#allocation7 + $0x158] sm:$0xf0]  ;;  %v4670_v29 = vor.u32 %v5316_v21, %v4669_v20 }
 0x1c2   :  { %v5373_v20 = vld [vmem:[#allocation7 + $0x218] sm:$0xf0] }
 0x1c3   :  { %v1992_v39 = vmax.f32 %v1911_v33, 0.0  ;;  %v1993_v10 = vmax.f32 %v1950_v34, 0.0  ;;  %v4802_v34 = vor.u32 %v5349_v28, %v4801_v27  ;;  %v4741_v28 = vld [vmem:[#allocation7 + $0xd8] sm:$0xf] }
 0x1c5   :  { %v5682_v5 = vpack.c.bf16 %v1992_v39, %v1992_v39  ;;  %v1996_v41 = vpack.c.bf16 %v1993_v10, %v1993_v10  ;;  %v4719_v39 = vld [vmem:[#allocation7 + $0xb4] sm:$0xf0]  ;;  %v4658_v10 = vor.u32 %v5313_v32, %v4657_v31 }
 0x1c6   :  { %v4885_v31 = vld [vmem:[#allocation7 + $0x1f8] sm:$0xf] }
 0x1c7   :  { %v1988_v46 = vpop.f32.mrf.mxu2  ;;  %2494 = vmatmul.bf16.vlgmr.msrb.gmra.mxu0 %v5682_v5  ;;  %2507 = vmatmul.bf16.vlgmr.msra.gmra.mxu1 %v1996_v41 }
 0x1c8   :  { %2533 = vmatmul.bf16.vlgmr.msra.gmra.mxu2 %v5682_v5  ;;  %v1912_v49 = vpop.f32.mrf.mxu1  ;;  %v1951_v50 = vpop.f32.mrf.mxu0  ;;  %2590 = vmatpush.bf16.msrb.mxu0 %v4630_v40  ;;  %v4546_v40 = vor.u32 %v5284_v37, %v4545_v36  ;;  %v4635_v36 = vld [vmem:[#allocation7 + $0xc] sm:$0xf0] }
 0x1c9   :  { %3097 = vmatpush.bf16.msra.mxu1 %v4718_v58  ;;  %v4645_v49 = vld [vmem:[#allocation7 + $0x18] sm:$0xf]  ;;  %v5310_v50 = vld [vmem:[#allocation7 + $0x20] sm:$0xf0]  ;;  %v4633_v58 = vld [vmem:[#allocation7] sm:$0xf] }
 0x1cc   :  { %2591 = vmatpush.bf16.msrb.mxu0 %v4618_v51  ;;  %v4646_v51 = vor.u32 %v5310_v50, %v4645_v49  ;;  %v5367_v49 = vld [vmem:[#allocation7 + $0x1e8] sm:$0xf0] }
 0x1cd   :  { %3098 = vmatpush.bf16.msra.mxu1 %v4706_v0  ;;  %v5315_v0 = vld [vmem:[#allocation7 + $0x4c] sm:$0xf] }
 0x1ce   :  { %v5339_v50 = vld [vmem:[#allocation7 + $0x10c] sm:$0xf] }
 0x1cf   :  { %v1990_v1 = vpop.f32.mrf.mxu2 }
 0x1d0   :  { %v1962_v4 = vpop.f32.mrf.mxu1  ;;  %2592 = vmatpush.bf16.msrb.mxu0 %v4606_v57  ;;  %v4686_v57 = vor.u32 %v5318_v54, %v4683_v56  ;;  %v4671_v1 = vld [vmem:[#allocation7 + $0x54] sm:$0xf0]  ;;  %v5375_v54 = vld [vmem:[#allocation7 + $0x22c] sm:$0xf] }
 0x1d1   :  { %v1963_v6 = vadd.f32 %v1962_v4, %v1487_v61  ;;  %3099 = vmatpush.bf16.msra.mxu1 %v4694_v9  ;;  %v4634_v61 = vor.u32 %v5307_v59, %v4633_v58  ;;  %v4674_v4 = vor.u32 %v5315_v0, %v4671_v1  ;;  %v4809_v56 = vld [vmem:[#allocation7 + $0x158] sm:$0xf]  ;;  %v5350_v58 = vld [vmem:[#allocation7 + $0x160] sm:$0xf0]  ;;  %v5372_v1 = vld [vmem:[#allocation7 + $0x214] sm:$0xf] }
 0x1d2   :  { %v4810_v59 = vor.u32 %v5350_v58, %v4809_v56 }
 0x1d3   :  { %v1976_v11 = vadd.f32 %v5669_v48, %v1963_v6  ;;  %v4557_v48 = vld [vmem:[#allocation6 + $0x1a0] sm:$0xf]  ;;  %v4765_v6 = vld [vmem:[#allocation7 + $0x108] sm:$0xf] }
 0x1d4   :  { %2593 = vmatpush.bf16.msrb.mxu0 %v4594_v13  ;;  %v4558_v33 = vor.u32 %v5287_v25, %v4557_v48  ;;  %v4818_v13 = vor.u32 %v5351_v2, %v4815_v3  ;;  %v4766_v9 = vor.u32 %v5340_v7, %v4765_v6  ;;  %v4647_v48 = vld [vmem:[#allocation7 + $0x24] sm:$0xf0]  ;;  %v4899_v2 = vld [vmem:[#allocation7 + $0x21c] sm:$0xf0]  ;;  %v5347_v6 = vld [vmem:[#allocation7 + $0x148] sm:$0xf0] }
 0x1d5   :  { %v1989_v14 = vadd.f32 %v1988_v46, %v1976_v11  ;;  %3100 = vmatpush.bf16.msra.mxu1 %v4682_v60  ;;  %v4695_v46 = vld [vmem:[#allocation7 + $0x84] sm:$0xf0]  ;;  %v5376_v11 = vld [vmem:[#allocation7 + $0x230] sm:$0xf0]  ;;  %v5337_v60 = vld [vmem:[#allocation7 + $0xf8] sm:$0xf0] }
 0x1d6   :  { %v4698_v47 = vor.u32 %v5321_v43, %v4695_v46  ;;  %v4754_v21 = vor.u32 %v5337_v60, %v4753_v16  ;;  %v4791_v25 = vld [vmem:[#allocation7 + $0x144] sm:$0xf0]  ;;  %v5331_v43 = vld [vmem:[#allocation7 + $0xc8] sm:$0xf0]  ;;  %v4873_v46 = vld [vmem:[#allocation7 + $0x1e0] sm:$0xf] }
 0x1d7   :  { %v1994_v18 = vmax.f32 %v1989_v14, 0.0  ;;  %2546 = vmatmul.bf16.vlgmr.msra.gmra.mxu0 %v1996_v41  ;;  %v5348_v14 = vld [vmem:[#allocation7 + $0x154] sm:$0xf]  ;;  %v4874_v52 = vor.u32 %v5367_v49, %v4873_v46  ;;  %v4785_v16 = vld [vmem:[#allocation7 + $0x128] sm:$0xf] }
 0x1d8   :  { %2585 = vmatmul.bf16.vlgmr.msrb.gmra.mxu2 %v1996_v41  ;;  %v1964_v26 = vpop.f32.mrf.mxu1  ;;  %2594 = vmatpush.bf16.msrb.mxu0 %v4582_v35  ;;  %v4722_v41 = vor.u32 %v5327_v38, %v4719_v39  ;;  %v4910_v35 = vor.u32 %v5376_v11, %v4909_v8  ;;  %v4806_v17 = vor.u32 %v5348_v14, %v4803_v15  ;;  %v5342_v39 = vld [vmem:[#allocation7 + $0x124] sm:$0xf]  ;;  %v4849_v8 = vld [vmem:[#allocation7 + $0x1b0] sm:$0xf]  ;;  %v5333_v11 = vld [vmem:[#allocation7 + $0xdc] sm:$0xf] }
 0x1d9   :  { %v1997_v24 = vpack.c.bf16 %v1994_v18, %v1994_v18  ;;  %3101 = vmatpush.bf16.msra.mxu1 %v4670_v29  ;;  %v4897_v18 = vld [vmem:[#allocation7 + $0x210] sm:$0xf]  ;;  %v5334_v29 = vld [vmem:[#allocation7 + $0xe0] sm:$0xf0]  ;;  %v4746_v14 = vor.u32 %v5333_v11, %v4743_v12  ;;  %v5360_v49 = vld [vmem:[#allocation7 + $0x1b4] sm:$0xf] }
 0x1da   :  { %3123 = vmatpush.bf16.msra.mxu2 %v4910_v35  ;;  %v4898_v26 = vor.u32 %v5373_v20, %v4897_v18  ;;  %v4742_v32 = vor.u32 %v5334_v29, %v4741_v28  ;;  %v5369_v35 = vld [vmem:[#allocation7 + $0x1fc] sm:$0xf]  ;;  %v4837_v18 = vld [vmem:[#allocation7 + $0x198] sm:$0xf]  ;;  %v5358_v20 = vld [vmem:[#allocation7 + $0x1a0] sm:$0xf0] }
 0x1db   :  { %2520 = vmatmul.bf16.vlgmr.msrb.gmra.mxu3 %v1997_v24  ;;  %2559 = vmatmul.bf16.vlgmr.msrb.gmra.mxu1 %v1997_v24  ;;  %v4773_v29 = vld [vmem:[#allocation7 + $0x110] sm:$0xf] }
 0x1dc   :  { %2595 = vmatpush.bf16.msrb.mxu0 %v4570_v23  ;;  %3110 = vmatpush.bf16.msrb.mxu3 %v4814_v19  ;;  %v5309_v23 = vld [vmem:[#allocation7 + $0x1c] sm:$0xf] }
 0x1dd   :  { %3102 = vmatpush.bf16.msra.mxu1 %v4658_v10  ;;  %v5345_v19 = vld [vmem:[#allocation7 + $0x13c] sm:$0xf]  ;;  %v4779_v10 = vld [vmem:[#allocation7 + $0x12c] sm:$0xf0] }
 0x1de   :  { %v4794_v27 = vor.u32 %v5345_v19, %v4791_v25  ;;  %3124 = vmatpush.bf16.msra.mxu2 %v4898_v26  ;;  %v4731_v19 = vld [vmem:[#allocation7 + $0xcc] sm:$0xf0] }
 0x1df   :  { %v4875_v25 = vld [vmem:[#allocation7 + $0x1ec] sm:$0xf0] }
 0x1e0   :  { %2596 = vmatpush.bf16.msrb.mxu0 %v4558_v33  ;;  %3111 = vmatpush.bf16.msrb.mxu3 %v4802_v34  ;;  %v5370_v33 = vld [vmem:[#allocation7 + $0x200] sm:$0xf0] }
 0x1e1   :  { %3103 = vmatpush.bf16.msra.mxu1 %v4646_v51  ;;  %v5306_v34 = vld [vmem:[#allocation7 + $0x4] sm:$0xf]  ;;  %v4886_v37 = vor.u32 %v5370_v33, %v4885_v31  ;;  %v4767_v51 = vld [vmem:[#allocation7 + $0x114] sm:$0xf0]  ;;  %v5341_v31 = vld [vmem:[#allocation7 + $0x118] sm:$0xf0] }
 0x1e2   :  { %v4638_v38 = vor.u32 %v5306_v34, %v4635_v36  ;;  %v4770_v45 = vor.u32 %v5339_v50, %v4767_v51  ;;  %v4825_v33 = vld [vmem:[#allocation7 + $0x180] sm:$0xf]  ;;  %v5355_v34 = vld [vmem:[#allocation7 + $0x188] sm:$0xf0] }
 0x1e3   :  { %3125 = vmatpush.bf16.msra.mxu2 %v4886_v37  ;;  %v4826_v36 = vor.u32 %v5355_v34, %v4825_v33  ;;  %v5363_v37 = vld [vmem:[#allocation7 + $0x1cc] sm:$0xf]  ;;  %v4851_v50 = vld [vmem:[#allocation7 + $0x1bc] sm:$0xf0] }
 0x1e4   :  { %2597 = vmatpush.bf16.msrb.mxu0 %v4546_v40  ;;  %3112 = vmatpush.bf16.msrb.mxu3 %v4790_v55  ;;  %v4821_v40 = vld [vmem:[#allocation7 + $0x170] sm:$0xf]  ;;  %v4911_v55 = vld [vmem:[#allocation7 + $0x234] sm:$0xf0]  ;;  %v4854_v51 = vor.u32 %v5360_v49, %v4851_v50  ;;  %v5311_v33 = vld [vmem:[#allocation7 + $0x28] sm:$0xf0] }
 0x1e5   :  { %3104 = vmatpush.bf16.msra.mxu1 %v4634_v61  ;;  %v4822_v22 = vor.u32 %v5353_v42, %v4821_v40  ;;  %v4861_v61 = vld [vmem:[#allocation7 + $0x1c8] sm:$0xf]  ;;  %v5329_v40 = vld [vmem:[#allocation7 + $0xb8] sm:$0xf0]  ;;  %v5338_v42 = vld [vmem:[#allocation7 + $0x100] sm:$0xf0] }
 0x1e6   :  { %v4893_v50 = vld [vmem:[#allocation7 + $0x200] sm:$0xf] }
 0x1e7   :  { %2598 = vmatmul.bf16.vlgmr.msrb.gmra.mxu0 %v1997_v24  ;;  %v4650_v24 = vor.u32 %v5309_v23, %v4647_v48  ;;  %3126 = vmatpush.bf16.msra.mxu2 %v4874_v52  ;;  %v4838_v48 = vor.u32 %v5358_v20, %v4837_v18  ;;  %v4713_v52 = vld [vmem:[#allocation7 + $0x98] sm:$0xf] }
 0x1e8   :  { %3136 = vmatpush.bf16.msra.mxu0 %v4722_v41  ;;  %v4782_v41 = vor.u32 %v5342_v39, %v4779_v10  ;;  %v4725_v39 = vld [vmem:[#allocation7 + $0xb0] sm:$0xf] }
 0x1e9   :  { %3149 = vmatpush.bf16.msrb.mxu1 %v4818_v13  ;;  %v4797_v13 = vld [vmem:[#allocation7 + $0x140] sm:$0xf] }
 0x1ea   :  { %v4798_v7 = vor.u32 %v5347_v6, %v4797_v13 }
 0x1eb   :  { %2572 = vmatmul.bf16.vlgmr.msra.gmra.mxu3 %v5682_v5  ;;  %v4778_v5 = vor.u32 %v5343_v63, %v4777_v62  ;;  %v5364_v62 = vld [vmem:[#allocation7 + $0x1d0] sm:$0xf0] }
 0x1ec   :  { %3137 = vmatpush.bf16.msra.mxu0 %v4710_v44  ;;  %v4729_v44 = vld [vmem:[#allocation7 + $0xc0] sm:$0xf]  ;;  %v5336_v63 = vld [vmem:[#allocation7 + $0xf4] sm:$0xf]  ;;  %v4862_v0 = vor.u32 %v5364_v62, %v4861_v61  ;;  %v5357_v61 = vld [vmem:[#allocation7 + $0x19c] sm:$0xf] }
 0x1ed   :  { %3113 = vmatpush.bf16.msrb.mxu3 %v4778_v5  ;;  %3150 = vmatpush.bf16.msrb.mxu1 %v4806_v17  ;;  %v4755_v5 = vld [vmem:[#allocation7 + $0xfc] sm:$0xf0]  ;;  %v5344_v17 = vld [vmem:[#allocation7 + $0x130] sm:$0xf0]  ;;  %v4839_v62 = vld [vmem:[#allocation7 + $0x1a4] sm:$0xf0] }
 0x1ee   :  { %v4758_v3 = vor.u32 %v5336_v63, %v4755_v5  ;;  %3127 = vmatpush.bf16.msra.mxu2 %v4862_v0  ;;  %v4786_v60 = vor.u32 %v5344_v17, %v4785_v16  ;;  %v4701_v63 = vld [vmem:[#allocation7 + $0x80] sm:$0xf]  ;;  %v4842_v0 = vor.u32 %v5357_v61, %v4839_v62  ;;  %v5323_v5 = vld [vmem:[#allocation7 + $0x88] sm:$0xf0]  ;;  %v4677_v16 = vld [vmem:[#allocation7 + $0x50] sm:$0xf] }
 0x1ef   :  { %v5317_v17 = vld [vmem:[#allocation7 + $0x58] sm:$0xf0]  ;;  %v4869_v62 = vld [vmem:[#allocation7 + $0x1d0] sm:$0xf] }
 0x1f0   :  { %3138 = vmatpush.bf16.msra.mxu0 %v4698_v47  ;;  %v4730_v47 = vor.u32 %v5331_v43, %v4729_v44  ;;  %v4678_v20 = vor.u32 %v5317_v17, %v4677_v16  ;;  %v5383_v16 = vld [vmem:[%s5793_s9 + $0x28] sm:$0xff] }
 0x1f1   :  { %3114 = vmatpush.bf16.msrb.mxu3 %v4766_v9  ;;  %3151 = vmatpush.bf16.msrb.mxu1 %v4794_v27  ;;  %v5361_v9 = vld [vmem:[#allocation7 + $0x1b8] sm:$0xf0]  ;;  %v5391_v17 = vld [vmem:[%s5793_s9 + $0x68] sm:$0xff] }
 0x1f2   :  { %v4850_v30 = vor.u32 %v5361_v9, %v4849_v8  ;;  %v4827_v8 = vld [vmem:[#allocation7 + $0x18c] sm:$0xf0]  ;;  %v4689_v9 = vld [vmem:[#allocation7 + $0x68] sm:$0xf] }
 0x1f4   :  { %3139 = vmatpush.bf16.msra.mxu0 %v4686_v57  ;;  %v4914_v57 = vor.u32 %v5375_v54, %v4911_v55  ;;  %3128 = vmatpush.bf16.msra.mxu2 %v4850_v30  ;;  %v4749_v54 = vld [vmem:[#allocation7 + $0xe0] sm:$0xf]  ;;  %v5696_v55 = vld [vmem:[%s5790_s6] sm:$0x7] }
 0x1f5   :  { %3115 = vmatpush.bf16.msrb.mxu3 %v4754_v21  ;;  %3152 = vmatpush.bf16.msrb.mxu1 %v4782_v41  ;;  %v5330_v21 = vld [vmem:[#allocation7 + $0xc4] sm:$0xf]  ;;  %v4761_v41 = vld [vmem:[#allocation7 + $0xf8] sm:$0xf]  ;;  %v2097_v58 = vperm.slane %v5696_v55, 1  ;;  %v2096_v11 = vperm.slane %v5696_v55, 0 }
 0x1f6   :  { %v4734_v27 = vor.u32 %v5330_v21, %v4731_v19  ;;  %v4762_v44 = vor.u32 %v5338_v42, %v4761_v41  ;;  %v4665_v21 = vld [vmem:[#allocation7 + $0x38] sm:$0xf] }
 0x1f7   :  { %v4905_v42 = vld [vmem:[#allocation7 + $0x218] sm:$0xf] }
 0x1f8   :  { %3140 = vmatpush.bf16.msra.mxu0 %v4674_v4  ;;  %v4902_v4 = vor.u32 %v5372_v1, %v4899_v2  ;;  %3129 = vmatpush.bf16.msra.mxu2 %v4838_v48  ;;  %v4737_v1 = vld [vmem:[#allocation7 + $0xc8] sm:$0xf]  ;;  %v5332_v2 = vld [vmem:[#allocation7 + $0xd0] sm:$0xf0]  ;;  %v5314_v48 = vld [vmem:[#allocation7 + $0x40] sm:$0xf0] }
 0x1f9   :  { %3116 = vmatpush.bf16.msrb.mxu3 %v4742_v32  ;;  %3153 = vmatpush.bf16.msrb.mxu1 %v4770_v45  ;;  %v4774_v32 = vor.u32 %v5341_v31, %v4773_v29  ;;  %v5326_v45 = vld [vmem:[#allocation7 + $0xa0] sm:$0xf0] }
 0x1fa   :  { %v4714_v56 = vor.u32 %v5326_v45, %v4713_v52  ;;  %v2098_v45 = vperm.slane %v5696_v55, 2 }
 0x1fc   :  { %3141 = vmatpush.bf16.msra.mxu0 %v4662_v53  ;;  %v4887_v53 = vld [vmem:[#allocation7 + $0x204] sm:$0xf0]  ;;  %3130 = vmatpush.bf16.msra.mxu2 %v4826_v36  ;;  %v4917_v36 = vld [vmem:[#allocation7 + $0x230] sm:$0xf] }
 0x1fd   :  { %3117 = vmatpush.bf16.msrb.mxu3 %v4730_v47  ;;  %3154 = vmatpush.bf16.msrb.mxu1 %v4758_v3  ;;  %v4890_v15 = vor.u32 %v5369_v35, %v4887_v53  ;;  %v4702_v3 = vor.u32 %v5323_v5, %v4701_v63  ;;  %v5320_v35 = vld [vmem:[#allocation7 + $0x70] sm:$0xf0]  ;;  %v5365_v63 = vld [vmem:[#allocation7 + $0x1d8] sm:$0xf0] }
 0x1fe   :  { %v4690_v53 = vor.u32 %v5320_v35, %v4689_v9  ;;  %v4870_v5 = vor.u32 %v5365_v63, %v4869_v62  ;;  %v5385_v35 = vld [vmem:[%s5793_s9 + $0x38] sm:$0xff] }
 0x200   :  { %3142 = vmatpush.bf16.msra.mxu0 %v4650_v24  ;;  %v5366_v24 = vld [vmem:[#allocation7 + $0x1e4] sm:$0xf] }
 0x201   :  { %3162 = vmatpush.bf16.msra.mxu3 %v4914_v57  ;;  %3155 = vmatpush.bf16.msrb.mxu1 %v4746_v14  ;;  %v4878_v28 = vor.u32 %v5366_v24, %v4875_v25  ;;  %v5335_v57 = vld [vmem:[#allocation7 + $0xe8] sm:$0xf0] }
 0x204   :  { %3143 = vmatpush.bf16.msra.mxu0 %v4638_v38  ;;  %v4863_v38 = vld [vmem:[#allocation7 + $0x1d4] sm:$0xf0] }
 0x205   :  { %3163 = vmatpush.bf16.msra.mxu3 %v4902_v4  ;;  %3156 = vmatpush.bf16.msrb.mxu1 %v4734_v27  ;;  %v4866_v10 = vor.u32 %v5363_v37, %v4863_v38  ;;  %v4738_v4 = vor.u32 %v5332_v2, %v4737_v1  ;;  %v4666_v27 = vor.u32 %v5314_v48, %v4665_v21  ;;  %v5377_v37 = vld [vmem:[#allocation7 + $0x238] sm:$0xf0]  ;;  %v4857_v2 = vld [vmem:[#allocation7 + $0x1b8] sm:$0xf]  ;;  %v5389_v21 = vld [vmem:[%s5793_s9 + $0x58] sm:$0xff] }
 0x206   :  { %v5401_v48 = vld [vmem:[%s5793_s9 + $0xb8] sm:$0xff] }
 0x208   :  { %3188 = vmatpush.bf16.msrb.mxu0 %v4822_v22  ;;  %v4726_v22 = vor.u32 %v5329_v40, %v4725_v39 }
 0x209   :  { %3164 = vmatpush.bf16.msra.mxu3 %v4890_v15 }
 0x20a   :  { %3175 = vmatpush.bf16.msrb.mxu2 %v4726_v22  ;;  %v5374_v22 = vld [vmem:[#allocation7 + $0x220] sm:$0xf0] }
 0x20b   :  { %v4906_v49 = vor.u32 %v5374_v22, %v4905_v42  ;;  %v2705_v42 = vld [vmem:[%s5792_s8] sm:$0x7] }
 0x20c   :  { %3189 = vmatpush.bf16.msrb.mxu0 %v4810_v59  ;;  %v4750_v59 = vor.u32 %v5335_v57, %v4749_v54  ;;  %v4881_v54 = vld [vmem:[#allocation7 + $0x1e8] sm:$0xf] }
 0x20d   :  { %3165 = vmatpush.bf16.msra.mxu3 %v4878_v28 }
 0x20e   :  { %3176 = vmatpush.bf16.msrb.mxu2 %v4714_v56  ;;  %v5368_v56 = vld [vmem:[#allocation7 + $0x1f0] sm:$0xf0] }
 0x210   :  { %3190 = vmatpush.bf16.msrb.mxu0 %v4798_v7  ;;  %v5354_v7 = vld [vmem:[#allocation7 + $0x184] sm:$0xf] }
 0x211   :  { %3166 = vmatpush.bf16.msra.mxu3 %v4866_v10  ;;  %v4830_v12 = vor.u32 %v5354_v7, %v4827_v8  ;;  %v4918_v10 = vor.u32 %v5377_v37, %v4917_v36  ;;  %v4845_v7 = vld [vmem:[#allocation7 + $0x1a0] sm:$0xf]  ;;  %v5359_v8 = vld [vmem:[#allocation7 + $0x1a8] sm:$0xf0] }
 0x212   :  { %3177 = vmatpush.bf16.msrb.mxu2 %v4702_v3  ;;  %v5362_v3 = vld [vmem:[#allocation7 + $0x1c0] sm:$0xf0]  ;;  %v4846_v9 = vor.u32 %v5359_v8, %v4845_v7  ;;  %v5398_v37 = vld [vmem:[%s5793_s9 + $0xa0] sm:$0xff] }
 0x213   :  { %v4858_v55 = vor.u32 %v5362_v3, %v4857_v2  ;;  %v2709_v2 = vperm.slane %v2705_v42, 2 }
 0x214   :  { %3191 = vmatpush.bf16.msrb.mxu0 %v4786_v60 }
 0x215   :  { %3167 = vmatpush.bf16.msra.mxu3 %v4854_v51  ;;  %v5371_v51 = vld [vmem:[#allocation7 + $0x208] sm:$0xf0] }
 0x216   :  { %3178 = vmatpush.bf16.msrb.mxu2 %v4690_v53  ;;  %v4894_v52 = vor.u32 %v5371_v51, %v4893_v50  ;;  %v5393_v53 = vld [vmem:[%s5793_s9 + $0x78] sm:$0xff] }
 0x218   :  { %3192 = vmatpush.bf16.msrb.mxu0 %v4774_v32  ;;  %v4653_v32 = vld [vmem:[#allocation7 + $0x20] sm:$0xf] }
 0x219   :  { %3168 = vmatpush.bf16.msra.mxu3 %v4842_v0  ;;  %v4654_v38 = vor.u32 %v5311_v33, %v4653_v32  ;;  %v5399_v32 = vld [vmem:[%s5793_s9 + $0xa8] sm:$0xff] }
 0x21a   :  { %3179 = vmatpush.bf16.msrb.mxu2 %v4678_v20  ;;  %v5381_v20 = vld [vmem:[%s5793_s9 + $0x18] sm:$0xff] }
 0x21c   :  { %3193 = vmatpush.bf16.msrb.mxu0 %v4762_v44 }
 0x21d   :  { %3169 = vmatpush.bf16.msra.mxu3 %v4830_v12 }
 0x21e   :  { %3180 = vmatpush.bf16.msrb.mxu2 %v4666_v27  ;;  %v5387_v27 = vld [vmem:[%s5793_s9 + $0x48] sm:$0xff] }
 0x220   :  { %3194 = vmatpush.bf16.msrb.mxu0 %v4750_v59  ;;  %v4882_v59 = vor.u32 %v5368_v56, %v4881_v54 }
 0x222   :  { %3181 = vmatpush.bf16.msrb.mxu2 %v4654_v38 }
 0x224   :  { %3195 = vmatpush.bf16.msrb.mxu0 %v4738_v4 }
 0x244   :  { %v5689_v26 = vpop.f32.mrf.mxu0  ;;  %v5691_v23 = vpop.f32.mrf.mxu1 }
 0x245   :  { %v2496_v60 = vadd.f32 %v5689_v26, %v2096_v11  ;;  %v4833_v11 = vld [vmem:[#allocation7 + $0x188] sm:$0xf] }
 0x247   :  { %v2509_v28 = vadd.f32 %v5691_v23, %v2496_v60  ;;  %v4641_v23 = vld [vmem:[#allocation7 + $0x8] sm:$0xf] }
 0x248   :  { %v5382_v60 = vld [vmem:[%s5793_s9 + $0x20] sm:$0xff] }
 0x24b   :  { %v2534_v43 = vpop.f32.mrf.mxu2 }
 0x24c   :  { %v2497_v46 = vpop.f32.mrf.mxu0  ;;  %v2510_v47 = vpop.f32.mrf.mxu1  ;;  %v2535_v30 = vadd.f32 %v2534_v43, %v2097_v58  ;;  %v5308_v43 = vld [vmem:[#allocation7 + $0x10] sm:$0xf0] }
 0x24d   :  { %v4642_v46 = vor.u32 %v5308_v43, %v4641_v23  ;;  %v5394_v43 = vld [vmem:[%s5793_s9 + $0x80] sm:$0xff] }
 0x24f   :  { %3182 = vmatpush.bf16.msrb.mxu2 %v4642_v46  ;;  %v2708_v46 = vperm.slane %v2705_v42, 1 }
 0x253   :  { %v2536_v13 = vpop.f32.mrf.mxu2 }
 0x254   :  { %v2547_v6 = vpop.f32.mrf.mxu0 }
 0x255   :  { %v2548_v14 = vadd.f32 %v2547_v6, %v2535_v30  ;;  %v5356_v30 = vld [vmem:[#allocation7 + $0x190] sm:$0xf0] }
 0x256   :  { %v4834_v12 = vor.u32 %v5356_v30, %v4833_v11 }
 0x258   :  { %v2560_v15 = vpop.f32.mrf.mxu1 }
 0x259   :  { %v2561_v18 = vadd.f32 %v2560_v15, %v2548_v14  ;;  %v5384_v14 = vld [vmem:[%s5793_s9 + $0x30] sm:$0xff] }
 0x25a   :  { %v5392_v15 = vld [vmem:[%s5793_s9 + $0x70] sm:$0xff] }
 0x25b   :  { %v2604_v19 = vmax.f32 %v2561_v18, 0.0  ;;  %v2586_v24 = vpop.f32.mrf.mxu2  ;;  %v5390_v18 = vld [vmem:[%s5793_s9 + $0x60] sm:$0xff] }
 0x25c   :  { %v2549_v25 = vpop.f32.mrf.mxu0 }
 0x25d   :  { %v2607_v29 = vpack.c.bf16 %v2604_v19, %v2604_v19  ;;  %v5380_v19 = vld [vmem:[%s5793_s9 + $0x10] sm:$0xff]  ;;  %v5379_v25 = vld [vmem:[%s5793_s9 + $0x8] sm:$0xff] }
 0x25e   :  { %v2521_v31 = vpop.f32.mrf.mxu3 }
 0x25f   :  { %v2522_v34 = vadd.f32 %v2521_v31, %v2509_v28  ;;  %3118 = vmatmul.bf16.vlgmr.msrb.gmra.mxu3 %v2607_v29  ;;  %v5400_v28 = vld [vmem:[%s5793_s9 + $0xb0] sm:$0xff]  ;;  %v5386_v31 = vld [vmem:[%s5793_s9 + $0x40] sm:$0xff] }
 0x260   :  { %v2562_v26 = vpop.f32.mrf.mxu1  ;;  %3416 = vmatpush.bf16.msrb.mxu3 %v5385_v35 }
 0x261   :  { %v2603_v39 = vmax.f32 %v2522_v34, 0.0  ;;  %v5397_v26 = vld [vmem:[%s5793_s9 + $0x98] sm:$0xff] }
 0x263   :  { %v2606_v40 = vpack.c.bf16 %v2603_v39, %v2603_v39  ;;  %v2588_v41 = vpop.f32.mrf.mxu2 }
 0x264   :  { %v2599_v44 = vpop.f32.mrf.mxu0  ;;  %3417 = vmatpush.bf16.msrb.mxu3 %v5384_v14  ;;  %v5395_v41 = vld [vmem:[%s5793_s9 + $0x88] sm:$0xff] }
 0x265   :  { %3105 = vmatmul.bf16.vlgmr.msra.gmra.mxu1 %v2606_v40  ;;  %3144 = vmatmul.bf16.vlgmr.msra.gmra.mxu0 %v2606_v40 }
 0x266   :  { %v2523_v47 = vpop.f32.mrf.mxu3  ;;  %3201 = vmatpush.bf16.msra.mxu1 %v4918_v10  ;;  %3442 = vmatpush.bf16.msra.mxu0 %v5401_v48 }
 0x268   :  { %3418 = vmatpush.bf16.msrb.mxu3 %v5383_v16 }
 0x26a   :  { %3202 = vmatpush.bf16.msra.mxu1 %v4906_v49  ;;  %3443 = vmatpush.bf16.msra.mxu0 %v5400_v28 }
 0x26c   :  { %v2601_v57 = vpop.f32.mrf.mxu0  ;;  %3419 = vmatpush.bf16.msrb.mxu3 %v5382_v60 }
 0x26e   :  { %v2573_v58 = vpop.f32.mrf.mxu3  ;;  %3203 = vmatpush.bf16.msra.mxu1 %v4894_v52  ;;  %3444 = vmatpush.bf16.msra.mxu0 %v5399_v32 }
 0x26f   :  { %v2574_v61 = vadd.f32 %v2573_v58, %v2098_v45 }
 0x270   :  { %3420 = vmatpush.bf16.msrb.mxu3 %v5381_v20 }
 0x271   :  { %v2587_v0 = vadd.f32 %v2586_v24, %v2574_v61  ;;  %v5388_v24 = vld [vmem:[%s5793_s9 + $0x50] sm:$0xff] }
 0x272   :  { %3204 = vmatpush.bf16.msra.mxu1 %v4882_v59  ;;  %3445 = vmatpush.bf16.msra.mxu0 %v5398_v37 }
 0x273   :  { %v2600_v1 = vadd.f32 %v2599_v44, %v2587_v0  ;;  %v2707_v44 = vperm.slane %v2705_v42, 0 }
 0x274   :  { %3421 = vmatpush.bf16.msrb.mxu3 %v5380_v19 }
 0x275   :  { %v2605_v4 = vmax.f32 %v2600_v1, 0.0  ;;  %3157 = vmatmul.bf16.vlgmr.msrb.gmra.mxu1 %v2607_v29  ;;  %3196 = vmatmul.bf16.vlgmr.msrb.gmra.mxu0 %v2607_v29  ;;  %v5378_v29 = vld [vmem:[%s5793_s9] sm:$0xff] }
 0x276   :  { %v2575_v13 = vpop.f32.mrf.mxu3  ;;  %3205 = vmatpush.bf16.msra.mxu1 %v4870_v5  ;;  %3446 = vmatpush.bf16.msra.mxu0 %v5397_v26 }
 0x277   :  { %v2608_v6 = vpack.c.bf16 %v2605_v4, %v2605_v4 }
 0x278   :  { %3422 = vmatpush.bf16.msrb.mxu3 %v5379_v25 }
 0x279   :  { %3131 = vmatmul.bf16.vlgmr.msra.gmra.mxu2 %v2608_v6  ;;  %3170 = vmatmul.bf16.vlgmr.msra.gmra.mxu3 %v2608_v6 }
 0x27a   :  { %3206 = vmatpush.bf16.msra.mxu1 %v4858_v55  ;;  %3429 = vmatpush.bf16.msra.mxu2 %v5393_v53 }
 0x27c   :  { %3423 = vmatpush.bf16.msrb.mxu3 %v5378_v29 }
 0x27e   :  { %3207 = vmatpush.bf16.msra.mxu1 %v4846_v9  ;;  %3430 = vmatpush.bf16.msra.mxu2 %v5392_v15 }
 0x282   :  { %3208 = vmatpush.bf16.msra.mxu1 %v4834_v12  ;;  %3431 = vmatpush.bf16.msra.mxu2 %v5391_v17  ;;  %v5408_v12 = vld [vmem:[%s5794_s10] ss:$0 sm:$0xff] }
 0x285   :  { %3209 = vmatmul.bf16.vlgmr.msra.gmra.mxu1 %v2608_v6 }
 0x286   :  { %3432 = vmatpush.bf16.msra.mxu2 %v5390_v18 }
 0x289   :  { %3183 = vmatmul.bf16.vlgmr.msrb.gmra.mxu2 %v2606_v40  ;;  %v5396_v40 = vld [vmem:[%s5793_s9 + $0x90] sm:$0xff] }
 0x28a   :  { %3433 = vmatpush.bf16.msra.mxu2 %v5389_v21  ;;  %3447 = vmatpush.bf16.msra.mxu0 %v5396_v40 }
 0x28e   :  { %3434 = vmatpush.bf16.msra.mxu2 %v5388_v24  ;;  %3448 = vmatpush.bf16.msra.mxu0 %v5395_v41 }
 0x292   :  { %3435 = vmatpush.bf16.msra.mxu2 %v5387_v27  ;;  %3449 = vmatpush.bf16.msra.mxu0 %v5394_v43 }
 0x296   :  { %3436 = vmatpush.bf16.msra.mxu2 %v5386_v31 }
 0x2e2   :  { %v3106_v33 = vpop.f32.mrf.mxu1  ;;  %v3119_v34 = vpop.f32.mrf.mxu3 }
 0x2e3   :  { %v3145_v36 = vpop.f32.mrf.mxu0  ;;  %v3107_v47 = vadd.f32 %v3106_v33, %v2707_v44 }
 0x2e4   :  { %v3146_v49 = vadd.f32 %v3145_v36, %v2708_v46 }
 0x2e5   :  { %v3120_v51 = vadd.f32 %v3119_v34, %v3107_v47 }
 0x2ea   :  { %v3108_v38 = vpop.f32.mrf.mxu1  ;;  %v3121_v39 = vpop.f32.mrf.mxu3 }
 0x2eb   :  { %v3147_v10 = vpop.f32.mrf.mxu0 }
 0x2f2   :  { %v3158_v22 = vpop.f32.mrf.mxu1 }
 0x2f3   :  { %v3197_v23 = vpop.f32.mrf.mxu0  ;;  %v3159_v52 = vadd.f32 %v3158_v22, %v3146_v49 }
 0x2fa   :  { %v3160_v50 = vpop.f32.mrf.mxu1 }
 0x2fb   :  { %v3199_v45 = vpop.f32.mrf.mxu0 }
 0x2fc   :  { %v3132_v54 = vpop.f32.mrf.mxu2  ;;  %v3171_v56 = vpop.f32.mrf.mxu3 }
 0x2fd   :  { %v3133_v57 = vadd.f32 %v3132_v54, %v3120_v51  ;;  %v3172_v58 = vadd.f32 %v3171_v56, %v3159_v52 }
 0x2ff   :  { %v3214_v59 = vmax.f32 %v3133_v57, 0.0  ;;  %v3215_v61 = vmax.f32 %v3172_v58, 0.0 }
 0x301   :  { %v3217_v62 = vpack.c.bf16 %v3214_v59, %v3214_v59  ;;  %v3218_v63 = vpack.c.bf16 %v3215_v61, %v3215_v61 }
 0x302   :  { %v3210_v0 = vpop.f32.mrf.mxu1 }
 0x303   :  { %3424 = vmatmul.bf16.vlgmr.msrb.gmra.mxu3 %v3217_v62  ;;  %3437 = vmatmul.bf16.vlgmr.msra.gmra.mxu2 %v3218_v63 }
 0x304   :  { %v3134_v5 = vpop.f32.mrf.mxu2  ;;  %v3173_v1 = vpop.f32.mrf.mxu3 }
 0x30a   :  { %v3212_v3 = vpop.f32.mrf.mxu1 }
 0x30c   :  { %v3184_v4 = vpop.f32.mrf.mxu2 }
 0x30d   :  { %v3185_v13 = vadd.f32 %v3184_v4, %v2709_v2 }
 0x30f   :  { %v3198_v55 = vadd.f32 %v3197_v23, %v3185_v13 }
 0x311   :  { %v3211_v6 = vadd.f32 %v3210_v0, %v3198_v55 }
 0x313   :  { %v3216_v7 = vmax.f32 %v3211_v6, 0.0 }
 0x314   :  { %v3186_v8 = vpop.f32.mrf.mxu2 }
 0x315   :  { %v3219_v9 = vpack.c.bf16 %v3216_v7, %v3216_v7 }
 0x317   :  { %3450 = vmatmul.bf16.vlgmr.msra.gmra.mxu0 %v3219_v9 }
 0x386   :  { %v3425_v11 = vpop.f32.mrf.mxu3  ;;  %v3438_v30 = vpop.f32.mrf.mxu2 }
 0x387   :  { %v3426_v14 = vadd.f32 %v5408_v12, %v3425_v11 }
 0x389   :  { %v3439_v15 = vadd.f32 %v3438_v30, %v3426_v14 }
 0x38e   :  { %v3427_v35 = vpop.f32.mrf.mxu3  ;;  %v3440_v53 = vpop.f32.mrf.mxu2 }
 0x394   :  { %v3451_v16 = vpop.f32.mrf.mxu0 }
 0x395   :  { %v3452_v17 = vadd.f32 %v3451_v16, %v3439_v15 }
 0x397   :  { %v3455_v60 = vpack.c.bf16 %v3452_v17, %v3452_v17 }
 0x399   :  { %3456 = vst [vmem:[%s5795_s11] sm:$0xf] %v3455_v60 }
 0x39c   :  { %v3453_v18 = vpop.f32.mrf.mxu0 }
 0x39d   :  { %3461 = vsyncpa [#allocation3], 1 }
 0x39e   :  { %3462 = vsyncpa [#allocation5], 1 }
 0x39f   :  { %3463 = vsyncpa [#allocation8], 1 }

</bundles_post_ra>
